<compile_context>
chip_gen: v7x
topology: tpu7x:2x2x1
jax: 0.10.0
libtpu: 0.0.40
codegen_flags: <defaults>
</compile_context>

<pallas_src>
import functools

import jax
import jax.numpy as jnp
from jax import lax
from jax.experimental import pallas as pl
from jax.experimental.pallas import tpu as pltpu

BOARD = 7                     # board_size
CIN = 2                       # input planes
CMID = 64                     # conv channels
K = 3                         # conv kernel size
FEAT = CMID * BOARD * BOARD   # 3136
NPOL = 2 * BOARD              # 14 policy logits
NTAP = K * K                  # 9 conv2 taps
PCOL = 5 * 5 * CIN            # 50 im2col columns of the 5x5 input window
PCOLX = PCOL + NTAP           # 59: im2col + 9 "off-board gate" columns
HEAD_W = 128                  # lane-dense fused head width (policy | value | zeros)
NCHUNK = BOARD                # 7 row-chunks per tile (one board row of positions)
BIG = 2.0 ** 20               # gate constant (exact in bf16), >> any activation


# ----------------------------- Pallas kernel ------------------------------- #

def fused_forward_kernel(p_ref, w1_ref, b1_ref, w2_ref, b2_ref, wh_ref, bh_ref,
                         out_ref):
    """One batch tile: conv1 + conv2 + both heads, chunked over board rows.

    p_ref  : (NCHUNK, 7*tb, PCOLX) bf16   im2col(+gates); rows ordered (w, board)
    w1_ref : (PCOLX, NTAP*CMID)    bf16   shifted conv1 weights + gate rows
    b1_ref : (1, NTAP*CMID)        f32    conv1 bias tiled per tap
    w2_ref : (NTAP*CMID, CMID)     bf16   conv2 im2col weight
    b2_ref : (1, CMID)             f32
    wh_ref : (NCHUNK, BOARD*CMID, HEAD_W) bf16  fused head weight, position-major
    bh_ref : (1, HEAD_W)           f32
    out_ref: (tb, HEAD_W)          f32    cols 0..13 policy, col 14 value
    """
    tb = out_ref.shape[0]

    def chunk_body(c, acc):
        # conv1 for all 9 conv2 taps of one board row of positions: ONE matmul.
        pc = p_ref[c]                                              # (7*tb, 59)
        tpre = jnp.dot(pc, w1_ref[...],
                       preferred_element_type=jnp.float32)         # (7*tb, 576)
        # bias + ReLU; off-board taps were pushed to -BIG by the gate columns,
        # so ReLU zeroes them -> this IS conv2's im2col, lane-dense, no stores.
        taps = jnp.maximum(tpre + b1_ref[...], 0.0).astype(jnp.bfloat16)
        h2 = jnp.dot(taps, w2_ref[...],
                     preferred_element_type=jnp.float32)            # (7*tb, 64)
        h2 = jnp.maximum(h2 + b2_ref[...], 0.0).astype(jnp.bfloat16)
        # fused policy/value head: accumulate position-sliced matmuls; the
        # (tb, 3136) feature relayout never materializes.
        whc = wh_ref[c]                                             # (7*64, 128)
        for j in range(BOARD):
            acc = acc + jnp.dot(h2[j * tb:(j + 1) * tb, :],
                                whc[j * CMID:(j + 1) * CMID, :],
                                preferred_element_type=jnp.float32)
        return acc

    acc = lax.fori_loop(0, NCHUNK, chunk_body,
                        jnp.zeros((tb, HEAD_W), jnp.float32))
    out = acc + bh_ref[...]
    lane = lax.broadcasted_iota(jnp.int32, out.shape, 1)
    out_ref[...] = jnp.where(lane == NPOL, jnp.tanh(out), out)


# ------------------------------- JAX glue ---------------------------------- #

def _round_up(n, m):
    return (n + m - 1) // m * m


def _choose_tile(batch, tile_boards):
    # multiple of 16 keeps bf16 sublane-aligned row slices inside the kernel
    tb = min(_round_up(tile_boards, 16), _round_up(batch, 16))
    # keep >= 2 tiles for mid/large batches so the "parallel" grid axis can
    # actually shard across both TensorCores on v7x.
    if batch >= 64 and _round_up(batch, tb) // tb < 2:
        tb = _round_up((batch + 1) // 2, 16)
    return tb


def _build_patches(x_nhwc_bf16):
    """(B,7,7,2) bf16 -> (B,7,7,59): 5x5 im2col + 9 off-board gate columns."""
    b = x_nhwc_bf16.shape[0]
    xp = jnp.pad(x_nhwc_bf16, ((0, 0), (2, 2), (2, 2), (0, 0)))
    taps = [xp[:, u:u + BOARD, v:v + BOARD, :] for u in range(5) for v in range(5)]
    pat = jnp.stack(taps, axis=3).reshape(b, BOARD, BOARD, PCOL)
    # gate column t == 1.0 iff conv2 tap t of this position falls off the board
    hh = jnp.arange(BOARD).reshape(BOARD, 1, 1)
    ww = jnp.arange(BOARD).reshape(1, BOARD, 1)
    tt = jnp.arange(NTAP).reshape(1, 1, NTAP)
    dh, dw = tt // K - 1, tt % K - 1
    valid = ((hh + dh >= 0) & (hh + dh < BOARD) &
             (ww + dw >= 0) & (ww + dw < BOARD))
    gates = (~valid).astype(jnp.bfloat16)
    gates = jnp.broadcast_to(gates[None], (b, BOARD, BOARD, NTAP))
    return jnp.concatenate([pat, gates], axis=-1)


@functools.partial(jax.jit, static_argnames=("tile_boards",))
def side_stacker_forward(x_nchw, kp, tile_boards=128):
    """Returns (policy (B,14) f32, value (B,1) f32)."""
    batch = x_nchw.shape[0]
    tb = _choose_tile(batch, tile_boards)
    bp = _round_up(batch, tb)
    n_tiles = bp // tb
    chunk_rows = NCHUNK * tb

    x_nhwc = jnp.transpose(x_nchw, (0, 2, 3, 1)).astype(jnp.bfloat16)
    if bp != batch:
        x_nhwc = jnp.pad(x_nhwc, ((0, bp - batch), (0, 0), (0, 0), (0, 0)))

    patches = _build_patches(x_nhwc)                        # (bp,7,7,59) bf16
    patches = patches.reshape(n_tiles, tb, BOARD * BOARD, PCOLX)
    patches = jnp.transpose(patches, (0, 2, 1, 3))          # (tiles, pos, board, 59)
    patches = patches.reshape(n_tiles * NCHUNK, chunk_rows, PCOLX)

    def const_spec(shape):
        ndim = len(shape)
        return pl.BlockSpec(shape, lambda i, _n=ndim: (0,) * _n)

    out = pl.pallas_call(
        fused_forward_kernel,
        out_shape=jax.ShapeDtypeStruct((bp, HEAD_W), jnp.float32),
        grid=(n_tiles,),
        in_specs=[
            pl.BlockSpec((NCHUNK, chunk_rows, PCOLX), lambda i: (i, 0, 0)),
            const_spec(kp['w1'].shape), const_spec(kp['b1'].shape),
            const_spec(kp['w2'].shape), const_spec(kp['b2'].shape),
            const_spec(kp['wh'].shape), const_spec(kp['bh'].shape),
        ],
        out_specs=pl.BlockSpec((tb, HEAD_W), lambda i: (i, 0)),
        compiler_params=pltpu.CompilerParams(
            dimension_semantics=("parallel",),
            vmem_limit_bytes=32 * 1024 * 1024,   # working set ~7 MB; safe on v7x
        ),
    )(patches, kp['w1'], kp['b1'], kp['w2'], kp['b2'], kp['wh'], kp['bh'])

    policy = out[:batch, :NPOL]
    value = out[:batch, NPOL:NPOL + 1]
    return policy, value


# ----------------------------- parameter prep ------------------------------ #

def init_params(key):
    """Deterministic synthetic params in PyTorch layout/shapes."""
    ks = jax.random.split(key, 8)
    s = 0.05
    return dict(
        w1=jax.random.normal(ks[0], (CMID, CIN, K, K), jnp.float32) * s,
        b1=jax.random.normal(ks[1], (CMID,), jnp.float32) * s,
        w2=jax.random.normal(ks[2], (CMID, CMID, K, K), jnp.float32) * s,
        b2=jax.random.normal(ks[3], (CMID,), jnp.float32) * s,
        wp=jax.random.normal(ks[4], (NPOL, FEAT), jnp.float32) * s,
        bp=jax.random.normal(ks[5], (NPOL,), jnp.float32) * s,
        wv=jax.random.normal(ks[6], (1, FEAT), jnp.float32) * s,
        bv=jax.random.normal(ks[7], (1,), jnp.float32) * s,
    )


def to_kernel_params(p):
    """PyTorch-layout weights -> fused-kernel layouts (bf16 MXU operands)."""
    # conv1 weight replicated per conv2 tap, shift absorbed into the 5x5 patch:
    # block for tap (dh,dw) places w1 (as (i,j,ci,co)) at window offset (dh,dw)
    # inside a zero (5,5,2,64) slab; flattened rows match the patch column order.
    w1_ijco = jnp.transpose(p['w1'], (2, 3, 1, 0))             # (3,3,2,64)
    blocks = []
    for dh in range(K):
        for dw in range(K):
            blk = jnp.zeros((5, 5, CIN, CMID), jnp.float32)
            blk = blk.at[dh:dh + K, dw:dw + K].set(w1_ijco)
            blocks.append(blk.reshape(PCOL, CMID))
    w1cat = jnp.concatenate(blocks, axis=1)                    # (50, 576)
    # gate rows: off-board indicator column t pushes tap t's preactivation to
    # -BIG, so the kernel's ReLU implements the board-edge mask for free.
    gate_rows = jnp.kron(jnp.eye(NTAP, dtype=jnp.float32),
                         jnp.ones((1, CMID), jnp.float32)) * (-BIG)   # (9, 576)
    w1x = jnp.concatenate([w1cat, gate_rows], axis=0)          # (59, 576)

    # conv2 im2col weight, (kh, kw, cin) x cout ordering.
    w2m = jnp.transpose(p['w2'], (2, 3, 1, 0)).reshape(K * K * CMID, CMID)

    # Fused heads, stored position-major ((h, w) slabs of 64 rows) so the
    # kernel contracts conv2 output directly without any feature relayout.
    # Lane-dense 128 columns: 0..13 policy, 14 value, rest zero.
    wp_hwc = jnp.transpose(p['wp'].reshape(NPOL, CMID, BOARD, BOARD),
                           (2, 3, 1, 0)).reshape(FEAT, NPOL)
    wv_hwc = jnp.transpose(p['wv'].reshape(1, CMID, BOARD, BOARD),
                           (2, 3, 1, 0)).reshape(FEAT, 1)
    wh = jnp.concatenate(
        [wp_hwc, wv_hwc, jnp.zeros((FEAT, HEAD_W - NPOL - 1), jnp.float32)],
        axis=1)
    wh = wh.reshape(NCHUNK, BOARD * CMID, HEAD_W)              # (7, 448, 128)
    bh = jnp.concatenate(
        [p['bp'], p['bv'],
         jnp.zeros((HEAD_W - NPOL - 1,), jnp.float32)]).reshape(1, HEAD_W)

    return dict(
        w1=w1x.astype(jnp.bfloat16),
        b1=jnp.tile(p['b1'].reshape(1, CMID), (1, NTAP)).astype(jnp.float32),
        w2=w2m.astype(jnp.bfloat16),
        b2=p['b2'].reshape(1, CMID).astype(jnp.float32),
        wh=wh.astype(jnp.bfloat16),
        bh=bh.astype(jnp.float32),
    )


# ------------------------ pure-JAX PyTorch reference ------------------------ #

def torch_ref(x, p):
    dn = ('NCHW', 'OIHW', 'NCHW')
    hi = lax.Precision.HIGHEST
    y = lax.conv_general_dilated(x, p['w1'], (1, 1), 'SAME',
                                 dimension_numbers=dn, precision=hi)
    y = jax.nn.relu(y + p['b1'][None, :, None, None])
    y = lax.conv_general_dilated(y, p['w2'], (1, 1), 'SAME',
                                 dimension_numbers=dn, precision=hi)
    y = jax.nn.relu(y + p['b2'][None, :, None, None])
    flat = y.reshape(y.shape[0], -1)                           # NCHW flatten
    pol = jnp.dot(flat, p['wp'].T, precision=hi) + p['bp']
    val = jnp.tanh(jnp.dot(flat, p['wv'].T, precision=hi) + p['bv'])
    return pol, val


if __name__ == "__main__":
    key = jax.random.PRNGKey(0)
    kx, kparam = jax.random.split(key)

    params = init_params(kparam)
    kp = to_kernel_params(params)

    # small single-tile check (B=2, matches the PyTorch module's (B,2,7,7) input)
    x = jax.random.normal(kx, (2, CIN, BOARD, BOARD), jnp.float32)
    policy, value = side_stacker_forward(x, kp)
    jax.block_until_ready((policy, value))

    pol_ref, val_ref = torch_ref(x, params)
    assert policy.shape == (2, NPOL) and value.shape == (2, 1)
    # tolerance covers bf16 MXU inputs (f32 accumulation) vs the f32 reference
    assert jnp.allclose(policy, pol_ref, atol=3e-2, rtol=3e-2)
    assert jnp.allclose(value, val_ref, atol=3e-2, rtol=3e-2)

    # multi-tile + padded-batch check exercising the grid / chunked-accum path
    x2 = jax.random.normal(jax.random.PRNGKey(1), (40, CIN, BOARD, BOARD),
                           jnp.float32)
    pol2, val2 = side_stacker_forward(x2, kp, tile_boards=16)
    jax.block_until_ready((pol2, val2))
    pol2_ref, val2_ref = torch_ref(x2, params)
    assert pol2.shape == (40, NPOL) and val2.shape == (40, 1)
    assert jnp.allclose(pol2, pol2_ref, atol=3e-2, rtol=3e-2)
    assert jnp.allclose(val2, val2_ref, atol=3e-2, rtol=3e-2)

    print("KERNEL_OK")
</pallas_src>

<mosaic_0001>
module attributes {stable_mosaic.version = 11 : i64} {
  func.func @fused_forward_kernel(%arg0: i32, %arg1: memref<7x112x59xbf16, #tpu.memory_space<vmem>>, %arg2: memref<59x576xbf16, #tpu.memory_space<vmem>>, %arg3: memref<1x576xf32, #tpu.memory_space<vmem>>, %arg4: memref<576x64xbf16, #tpu.memory_space<vmem>>, %arg5: memref<1x64xf32, #tpu.memory_space<vmem>>, %arg6: memref<7x448x128xbf16, #tpu.memory_space<vmem>>, %arg7: memref<1x128xf32, #tpu.memory_space<vmem>>, %arg8: memref<16x128xf32, #tpu.memory_space<vmem>>) attributes {dimension_semantics = [#tpu.dimension_semantics<parallel>], iteration_bounds = array<i64: 1>, scalar_prefetch = 0 : i64, scratch_operands = 0 : i64, tpu.core_type = #tpu.core_type<tc>, window_params = [{transform_indices = @transform_0, window_bounds = array<i64: 7, 112, 59>}, {pipeline_mode = #tpu.pipeline_mode<synchronous>, transform_indices = @transform_1, window_bounds = array<i64: 59, 576>}, {pipeline_mode = #tpu.pipeline_mode<synchronous>, transform_indices = @transform_2, window_bounds = array<i64: 1, 576>}, {pipeline_mode = #tpu.pipeline_mode<synchronous>, transform_indices = @transform_3, window_bounds = array<i64: 576, 64>}, {pipeline_mode = #tpu.pipeline_mode<synchronous>, transform_indices = @transform_4, window_bounds = array<i64: 1, 64>}, {pipeline_mode = #tpu.pipeline_mode<synchronous>, transform_indices = @transform_5, window_bounds = array<i64: 7, 448, 128>}, {pipeline_mode = #tpu.pipeline_mode<synchronous>, transform_indices = @transform_6, window_bounds = array<i64: 1, 128>}, {transform_indices = @transform_7, window_bounds = array<i64: 16, 128>}]} {
    %cst = arith.constant 0.000000e+00 : f32
    %0 = vector.broadcast %cst : f32 to vector<16x128xf32>
    %c0_i32 = arith.constant 0 : i32
    %c7_i32 = arith.constant 7 : i32
    %1 = arith.addi %c0_i32, %c7_i32 : i32
    %c1_i32 = arith.constant 1 : i32
    %2 = scf.for %arg9 = %c0_i32 to %1 step %c1_i32 iter_args(%arg10 = %0) -> (vector<16x128xf32>)  : i32 {
      %12 = arith.index_cast %arg9 : i32 to index
      %c0_4 = arith.constant 0 : index
      %c0_5 = arith.constant 0 : index
      %13 = vector.load %arg1[%12, %c0_4, %c0_5] : memref<7x112x59xbf16, #tpu.memory_space<vmem>>, vector<1x112x59xbf16>
      %14 = vector.shape_cast %13 : vector<1x112x59xbf16> to vector<112x59xbf16>
      %c0_6 = arith.constant 0 : index
      %c0_7 = arith.constant 0 : index
      %15 = vector.load %arg2[%c0_6, %c0_7] : memref<59x576xbf16, #tpu.memory_space<vmem>>, vector<59x576xbf16>
      %cst_8 = arith.constant dense<0.000000e+00> : vector<112x576xf32>
      %16 = tpu.matmul %14, %15, %cst_8 {dimension_numbers = #tpu.dot_dimension_numbers<[1], [0], [0], [1], [0, 0, 1, 1], [], []>} : vector<112x59xbf16>, vector<59x576xbf16>, vector<112x576xf32> -> vector<112x576xf32>
      %c0_9 = arith.constant 0 : index
      %c0_10 = arith.constant 0 : index
      %17 = vector.load %arg3[%c0_9, %c0_10] : memref<1x576xf32, #tpu.memory_space<vmem>>, vector<1x576xf32>
      %18 = vector.broadcast %17 : vector<1x576xf32> to vector<112x576xf32>
      %19 = arith.addf %16, %18 : vector<112x576xf32>
      %cst_11 = arith.constant 0.000000e+00 : f32
      %20 = vector.broadcast %cst_11 : f32 to vector<112x576xf32>
      %21 = arith.maximumf %19, %20 : vector<112x576xf32>
      %22 = arith.truncf %21 : vector<112x576xf32> to vector<112x576xbf16>
      %c0_12 = arith.constant 0 : index
      %c0_13 = arith.constant 0 : index
      %23 = vector.load %arg4[%c0_12, %c0_13] : memref<576x64xbf16, #tpu.memory_space<vmem>>, vector<576x64xbf16>
      %cst_14 = arith.constant dense<0.000000e+00> : vector<112x64xf32>
      %24 = tpu.matmul %22, %23, %cst_14 {dimension_numbers = #tpu.dot_dimension_numbers<[1], [0], [0], [1], [0, 0, 1, 1], [], []>} : vector<112x576xbf16>, vector<576x64xbf16>, vector<112x64xf32> -> vector<112x64xf32>
      %c0_15 = arith.constant 0 : index
      %c0_16 = arith.constant 0 : index
      %25 = vector.load %arg5[%c0_15, %c0_16] : memref<1x64xf32, #tpu.memory_space<vmem>>, vector<1x64xf32>
      %26 = vector.broadcast %25 : vector<1x64xf32> to vector<112x64xf32>
      %27 = arith.addf %24, %26 : vector<112x64xf32>
      %cst_17 = arith.constant 0.000000e+00 : f32
      %28 = vector.broadcast %cst_17 : f32 to vector<112x64xf32>
      %29 = arith.maximumf %27, %28 : vector<112x64xf32>
      %30 = arith.truncf %29 : vector<112x64xf32> to vector<112x64xbf16>
      %31 = arith.index_cast %arg9 : i32 to index
      %c0_18 = arith.constant 0 : index
      %c0_19 = arith.constant 0 : index
      %32 = vector.load %arg6[%31, %c0_18, %c0_19] : memref<7x448x128xbf16, #tpu.memory_space<vmem>>, vector<1x448x128xbf16>
      %33 = vector.shape_cast %32 : vector<1x448x128xbf16> to vector<448x128xbf16>
      %34 = vector.extract_strided_slice %30 {offsets = [0, 0], sizes = [16, 64], strides = [1, 1]} : vector<112x64xbf16> to vector<16x64xbf16>
      %35 = vector.extract_strided_slice %33 {offsets = [0, 0], sizes = [64, 128], strides = [1, 1]} : vector<448x128xbf16> to vector<64x128xbf16>
      %cst_20 = arith.constant dense<0.000000e+00> : vector<16x128xf32>
      %36 = tpu.matmul %34, %35, %cst_20 {dimension_numbers = #tpu.dot_dimension_numbers<[1], [0], [0], [1], [0, 0, 1, 1], [], []>} : vector<16x64xbf16>, vector<64x128xbf16>, vector<16x128xf32> -> vector<16x128xf32>
      %37 = arith.addf %arg10, %36 : vector<16x128xf32>
      %38 = vector.extract_strided_slice %30 {offsets = [16, 0], sizes = [16, 64], strides = [1, 1]} : vector<112x64xbf16> to vector<16x64xbf16>
      %39 = vector.extract_strided_slice %33 {offsets = [64, 0], sizes = [64, 128], strides = [1, 1]} : vector<448x128xbf16> to vector<64x128xbf16>
      %cst_21 = arith.constant dense<0.000000e+00> : vector<16x128xf32>
      %40 = tpu.matmul %38, %39, %cst_21 {dimension_numbers = #tpu.dot_dimension_numbers<[1], [0], [0], [1], [0, 0, 1, 1], [], []>} : vector<16x64xbf16>, vector<64x128xbf16>, vector<16x128xf32> -> vector<16x128xf32>
      %41 = arith.addf %37, %40 : vector<16x128xf32>
      %42 = vector.extract_strided_slice %30 {offsets = [32, 0], sizes = [16, 64], strides = [1, 1]} : vector<112x64xbf16> to vector<16x64xbf16>
      %43 = vector.extract_strided_slice %33 {offsets = [128, 0], sizes = [64, 128], strides = [1, 1]} : vector<448x128xbf16> to vector<64x128xbf16>
      %cst_22 = arith.constant dense<0.000000e+00> : vector<16x128xf32>
      %44 = tpu.matmul %42, %43, %cst_22 {dimension_numbers = #tpu.dot_dimension_numbers<[1], [0], [0], [1], [0, 0, 1, 1], [], []>} : vector<16x64xbf16>, vector<64x128xbf16>, vector<16x128xf32> -> vector<16x128xf32>
      %45 = arith.addf %41, %44 : vector<16x128xf32>
      %46 = vector.extract_strided_slice %30 {offsets = [48, 0], sizes = [16, 64], strides = [1, 1]} : vector<112x64xbf16> to vector<16x64xbf16>
      %47 = vector.extract_strided_slice %33 {offsets = [192, 0], sizes = [64, 128], strides = [1, 1]} : vector<448x128xbf16> to vector<64x128xbf16>
      %cst_23 = arith.constant dense<0.000000e+00> : vector<16x128xf32>
      %48 = tpu.matmul %46, %47, %cst_23 {dimension_numbers = #tpu.dot_dimension_numbers<[1], [0], [0], [1], [0, 0, 1, 1], [], []>} : vector<16x64xbf16>, vector<64x128xbf16>, vector<16x128xf32> -> vector<16x128xf32>
      %49 = arith.addf %45, %48 : vector<16x128xf32>
      %50 = vector.extract_strided_slice %30 {offsets = [64, 0], sizes = [16, 64], strides = [1, 1]} : vector<112x64xbf16> to vector<16x64xbf16>
      %51 = vector.extract_strided_slice %33 {offsets = [256, 0], sizes = [64, 128], strides = [1, 1]} : vector<448x128xbf16> to vector<64x128xbf16>
      %cst_24 = arith.constant dense<0.000000e+00> : vector<16x128xf32>
      %52 = tpu.matmul %50, %51, %cst_24 {dimension_numbers = #tpu.dot_dimension_numbers<[1], [0], [0], [1], [0, 0, 1, 1], [], []>} : vector<16x64xbf16>, vector<64x128xbf16>, vector<16x128xf32> -> vector<16x128xf32>
      %53 = arith.addf %49, %52 : vector<16x128xf32>
      %54 = vector.extract_strided_slice %30 {offsets = [80, 0], sizes = [16, 64], strides = [1, 1]} : vector<112x64xbf16> to vector<16x64xbf16>
      %55 = vector.extract_strided_slice %33 {offsets = [320, 0], sizes = [64, 128], strides = [1, 1]} : vector<448x128xbf16> to vector<64x128xbf16>
      %cst_25 = arith.constant dense<0.000000e+00> : vector<16x128xf32>
      %56 = tpu.matmul %54, %55, %cst_25 {dimension_numbers = #tpu.dot_dimension_numbers<[1], [0], [0], [1], [0, 0, 1, 1], [], []>} : vector<16x64xbf16>, vector<64x128xbf16>, vector<16x128xf32> -> vector<16x128xf32>
      %57 = arith.addf %53, %56 : vector<16x128xf32>
      %58 = vector.extract_strided_slice %30 {offsets = [96, 0], sizes = [16, 64], strides = [1, 1]} : vector<112x64xbf16> to vector<16x64xbf16>
      %59 = vector.extract_strided_slice %33 {offsets = [384, 0], sizes = [64, 128], strides = [1, 1]} : vector<448x128xbf16> to vector<64x128xbf16>
      %cst_26 = arith.constant dense<0.000000e+00> : vector<16x128xf32>
      %60 = tpu.matmul %58, %59, %cst_26 {dimension_numbers = #tpu.dot_dimension_numbers<[1], [0], [0], [1], [0, 0, 1, 1], [], []>} : vector<16x64xbf16>, vector<64x128xbf16>, vector<16x128xf32> -> vector<16x128xf32>
      %61 = arith.addf %57, %60 : vector<16x128xf32>
      scf.yield %61 : vector<16x128xf32>
    }
    %c7_i32_0 = arith.constant 7 : i32
    %c0 = arith.constant 0 : index
    %c0_1 = arith.constant 0 : index
    %3 = vector.load %arg7[%c0, %c0_1] : memref<1x128xf32, #tpu.memory_space<vmem>>, vector<1x128xf32>
    %4 = vector.broadcast %3 : vector<1x128xf32> to vector<16x128xf32>
    %5 = arith.addf %2, %4 : vector<16x128xf32>
    %6 = tpu.iota {dimensions = array<i32: 1>} : vector<16x128xi32>
    %c14_i32 = arith.constant 14 : i32
    %7 = vector.broadcast %c14_i32 : i32 to vector<16x128xi32>
    %8 = arith.cmpi eq, %6, %7 : vector<16x128xi32>
    %9 = math.tanh %5 : vector<16x128xf32>
    %10 = arith.select %8, %9, %5 : vector<16x128xi1>, vector<16x128xf32>
    %c0_2 = arith.constant 0 : index
    %c0_3 = arith.constant 0 : index
    %11 = vector.load %arg8[%c0_2, %c0_3] : memref<16x128xf32, #tpu.memory_space<vmem>>, vector<16x128xf32>
    tpu.vector_store %arg8[%c0_2, %c0_3], %10 {strides = array<i32>} : memref<16x128xf32, #tpu.memory_space<vmem>>, vector<16x128xf32>,
    return
  }
  func.func @transform_0(%arg0: i32) -> (i32, i32, i32) {
    %c0_i32 = arith.constant 0 : i32
    %c0_i32_0 = arith.constant 0 : i32
    %c0_i32_1 = arith.constant 0 : i32
    return %arg0, %c0_i32, %c0_i32_0 : i32, i32, i32
  }
  func.func @transform_1(%arg0: i32) -> (i32, i32) {
    %c0_i32 = arith.constant 0 : i32
    %c0_i32_0 = arith.constant 0 : i32
    %c0_i32_1 = arith.constant 0 : i32
    return %c0_i32, %c0_i32_0 : i32, i32
  }
  func.func @transform_2(%arg0: i32) -> (i32, i32) {
    %c0_i32 = arith.constant 0 : i32
    %c0_i32_0 = arith.constant 0 : i32
    %c0_i32_1 = arith.constant 0 : i32
    return %c0_i32, %c0_i32_0 : i32, i32
  }
  func.func @transform_3(%arg0: i32) -> (i32, i32) {
    %c0_i32 = arith.constant 0 : i32
    %c0_i32_0 = arith.constant 0 : i32
    %c0_i32_1 = arith.constant 0 : i32
    return %c0_i32, %c0_i32_0 : i32, i32
  }
  func.func @transform_4(%arg0: i32) -> (i32, i32) {
    %c0_i32 = arith.constant 0 : i32
    %c0_i32_0 = arith.constant 0 : i32
    %c0_i32_1 = arith.constant 0 : i32
    return %c0_i32, %c0_i32_0 : i32, i32
  }
  func.func @transform_5(%arg0: i32) -> (i32, i32, i32) {
    %c0_i32 = arith.constant 0 : i32
    %c0_i32_0 = arith.constant 0 : i32
    %c0_i32_1 = arith.constant 0 : i32
    %c0_i32_2 = arith.constant 0 : i32
    return %c0_i32, %c0_i32_0, %c0_i32_1 : i32, i32, i32
  }
  func.func @transform_6(%arg0: i32) -> (i32, i32) {
    %c0_i32 = arith.constant 0 : i32
    %c0_i32_0 = arith.constant 0 : i32
    %c0_i32_1 = arith.constant 0 : i32
    return %c0_i32, %c0_i32_0 : i32, i32
  }
  func.func @transform_7(%arg0: i32) -> (i32, i32) {
    %c0_i32 = arith.constant 0 : i32
    %c0_i32_0 = arith.constant 0 : i32
    return %arg0, %c0_i32 : i32, i32
  }
}

</mosaic_0001>

<bundles_post_ra>
// kernel: side_stacker_forward.1
= control target key start
LH: loop header
LB: loop body
LE: loop exit
PB: predicated region body
PF: predicated region fallthrough
CT: control target
= control target key end

     0   :  { %v2555_v0 = vmov 0.0   ;;  %v2557_v1 = vmov 0.0   ;;  %s2559_s24 = smov 0   ;;  %s3110_s0 = inlined_call_operand.vmem [shape: bf16[7,112,59], index: 0, kind: input, shape index: {}]   ;;  %s3111_s1 = inlined_call_operand.vmem [shape: bf16[59,576], index: 1, kind: input, shape index: {}]   ;;  %s3112_s2 = inlined_call_operand.vmem [shape: f32[1,576], index: 2, kind: input, shape index: {}]   ;;  %s3113_s3 = inlined_call_operand.vmem [shape: bf16[576,64], index: 3, kind: input, shape index: {}]   ;;  %s3114_s4 = inlined_call_operand.vmem [shape: f32[1,64], index: 4, kind: input, shape index: {}]   ;;  %s3115_s5 = inlined_call_operand.vmem [shape: bf16[7,448,128], index: 5, kind: input, shape index: {}]   ;;  %s3116_s6 = inlined_call_operand.vmem [shape: f32[1,128], index: 6, kind: input, shape index: {}]   ;;  %s3117_s7 = inlined_call_operand.vmem [shape: f32[16,128], index: 7, kind: output, shape index: {}]  }
   0x1 LB: > { %v2384_v2 = vld [vmem:[%s3111_s1 + $0x4] ss:$20 sps:$4 sm:$0xff]   ;;  %vm259_vm0 = vcmask 1044480   ;;  %v2386_v3 = vld [vmem:[%s3111_s1] ss:$20 sps:$4 sm:$0xff]   ;;  %vm260_vm1 = vcmask 1045504   ;;  %s2509_s24 = sphi %s2559_s24, %s32_s24   ;;  %v2505_v1 = vphi %v2557_v1, %v3119_v1   ;;  %v2501_v0 = vphi %v2555_v0, %v3118_v0  }
   0x2   : > { %278 = vmatprep.subr.bf16.mxu1 %v2384_v2  ;;  %v2387_v4 = vld [vmem:[%s3111_s1 + $0x2c] ss:$20 sps:$4 sm:$0xff]   ;;  %v2511_v5 = vmov 65535   ;;  %v2512_v7 = vmov 0   ;;  %v2389_v8 = vld [vmem:[%s3111_s1 + $0x28] ss:$20 sps:$4 sm:$0xff]  }
   0x3   : > { %v261_v6 = vsel %vm259_vm0, 4294967295, %v2511_v5  ;;  %310 = vmatprep.mubr.bf16.mxu1 %v2512_v7  ;;  %279 = vmatpush1.bf16.msra.mxu1 %v2386_v3  ;;  %v2390_v9 = vld [vmem:[%s3111_s1 + $0x54] ss:$20 sps:$4 sm:$0xff]   ;;  %v2393_v10 = vld [vmem:[%s3111_s1 + $0x7c] ss:$20 sps:$4 sm:$0x3f]  }
   0x4   : > { %280 = vmatprep.subr.bf16.mxu1 %v2387_v4  ;;  %v262_v11 = vsel %vm260_vm1, %v261_v6, 0  ;;  %s1999_s14 = smul.u32 56, %s2509_s24  ;;  %v2395_v12 = vld [vmem:[%s3111_s1 + $0x78] ss:$20 sps:$4 sm:$0x3f]   ;;  %v2513_v15 = vmov 0.0  }
   0x5   : > { %v2392_v13 = vld [vmem:[%s3111_s1 + $0x50] ss:$20 sps:$4 sm:$0xff]   ;;  %v267_v14 = vand.u32 %v2393_v10, %v262_v11  ;;  %2174 = vmatprep.subr.bf16.mxu0 %v2513_v15  ;;  %vm2514_vm2 = vmmov 0   ;;  %v264_v16 = vand.u32 %v2395_v12, %v262_v11  ;;  %v2399_v17 = vld [vmem:[%s3111_s1 + $0xc] ss:$20 sps:$4 sm:$0xff]   ;;  %vm237_vm3 = vcmask 482304  }
   0x6   : > { %s2599_s21 = scalar_lea.vmem %s3110_s0, %s1999_s14  ;;  %2182 = vmatprep.mubr.msk.bf16.mxu0 %vm2514_vm2, %v2513_v15  ;;  %v2397_v19 = vld [vmem:[%s3111_s1 + $0x8] ss:$20 sps:$4 sm:$0xff]   ;;  %v2401_v21 = vld [vmem:[%s3111_s1 + $0x30] ss:$20 sps:$4 sm:$0xff]   ;;  %v2416_v25 = vld [vmem:[%s3111_s1 + $0x38] ss:$20 sps:$4 sm:$0xff]  }
   0x7   : > { %281 = vmatpush1.bf16.msra.mxu1 %v2389_v8  ;;  %v2608_v18 = vld [vmem:[%s2599_s21] sm:$0xff]   ;;  %v2403_v20 = vld [vmem:[%s3111_s1 + $0x34] ss:$20 sps:$4 sm:$0xff]   ;;  %v2408_v22 = vld [vmem:[%s3111_s1 + $0x5c] ss:$20 sps:$4 sm:$0xff]   ;;  %s2000_s28 = smul.u32 224, %s2509_s24 }
   0x8   : > { %282 = vmatprep.subr.bf16.mxu1 %v2390_v9  ;;  %v2413_v23 = vld [vmem:[%s3111_s1 + $0x84] ss:$20 sps:$4 sm:$0x3f]   ;;  %v2411_v27 = vld [vmem:[%s3111_s1 + $0x80] ss:$20 sps:$4 sm:$0x3f]   ;;  %v78_v9 = vlaneseq }
   0x9   : > { %v2414_v24 = vld [vmem:[%s3111_s1 + $0x10] ss:$20 sps:$4 sm:$0xff]   ;;  %v2406_v26 = vld [vmem:[%s3111_s1 + $0x58] ss:$20 sps:$4 sm:$0xff]   ;;  %v273_v30 = vand.u32 %v2413_v23, %v262_v11  ;;  %v2417_v31 = vld [vmem:[%s3111_s1 + $0x60] ss:$20 sps:$4 sm:$0xff]   ;;  %v270_v32 = vand.u32 %v2411_v27, %v262_v11  ;;  %s2673_s8 = scalar_lea.vmem %s3115_s5, %s2000_s28 }
   0xa   : > { %2175 = vmatpush3.bf16.msra.mxu0 %v2414_v24  ;;  %v2400_v28 = vld [vmem:[%s2599_s21 + $0x8] sm:$0xff]   ;;  %v2419_v34 = vld [vmem:[%s3113_s3 + $0x40] sm:$0xff]   ;;  %v2404_v35 = vld [vmem:[%s2599_s21 + $0x10] sm:$0xff]   ;;  %v2806_v10 = vshrl.u32 %v78_v9, 7  ;;  %vm973_vm4 = vcmask 523264   ;;  %s32_s24 = sadd.s32 1, %s2509_s24  }
   0xb   : > { %283 = vmatpush1.bf16.msra.mxu1 %v2392_v13  ;;  %2176 = vmatprep.subr.bf16.mxu0 %v2513_v15  ;;  %v2418_v29 = vld [vmem:[%s3111_s1 + $0x88] ss:$20 sps:$4 sm:$0x3f]   ;;  %v2409_v37 = vld [vmem:[%s2599_s21 + $0x20] sm:$0xff]   ;;  %v2415_v39 = vld [vmem:[%s2599_s21 + $0x30] sm:$0xff]   ;;  %p29_p0 = scmp.ge.s32.totalorder %s32_s24, 7  }
   0xc   : > { %284 = vmatprep.subr.bf16.mxu1 %v267_v14  ;;  %v276_v33 = vand.u32 %v2418_v29, %v262_v11  ;;  %v2405_v36 = vld [vmem:[%s2599_s21 + $0x18] sm:$0xff]   ;;  %v2410_v38 = vld [vmem:[%s2599_s21 + $0x28] sm:$0xff]   ;;  %v2420_v40 = vld [vmem:[%s3113_s3] sm:$0xff]   ;;  %v80_v11 = vsub.s32 0, %v2806_v10  ;;  %v84_v13 = vsub.s32 1, %v2806_v10 }
   0xd   : > { %v2421_v41 = vld [vmem:[%s3113_s3 + $0x48] sm:$0xff]   ;;  %v2423_v43 = vld [vmem:[%s3113_s3 + $0x50] sm:$0xff]   ;;  %v2425_v45 = vld [vmem:[%s3113_s3 + $0x58] sm:$0xff]  }
   0xe   : > { %2177 = vmatpush3.bf16.msra.mxu0 %v2416_v25  ;;  %v2422_v42 = vld [vmem:[%s3113_s3 + $0x8] sm:$0xff]   ;;  %v2424_v44 = vld [vmem:[%s3113_s3 + $0x10] sm:$0xff]   ;;  %v2426_v46 = vld [vmem:[%s3113_s3 + $0x18] sm:$0xff]  }
   0xf   : > { %285 = vmatpush1.bf16.msra.mxu1 %v264_v16  ;;  %2178 = vmatprep.subr.bf16.mxu0 %v2513_v15  ;;  %v2427_v47 = vld [vmem:[%s3113_s3 + $0x60] sm:$0xff]   ;;  %v2429_v49 = vld [vmem:[%s3113_s3 + $0x68] sm:$0xff]   ;;  %v2431_v51 = vld [vmem:[%s3113_s3 + $0x70] sm:$0xff]  }
  0x10   : > { %381 = vmatprep.subr.bf16.mxu1 %v2399_v17  ;;  %v2428_v48 = vld [vmem:[%s3113_s3 + $0x20] sm:$0xff]   ;;  %v2430_v50 = vld [vmem:[%s3113_s3 + $0x28] sm:$0xff]   ;;  %v2432_v52 = vld [vmem:[%s3113_s3 + $0x30] sm:$0xff]  }
  0x11   : > { %v2433_v53 = vld [vmem:[%s3113_s3 + $0x78] sm:$0xff]   ;;  %v2435_v55 = vld [vmem:[%s3113_s3 + $0xc0] sm:$0xff]   ;;  %v2438_v57 = vld [vmem:[%s3113_s3 + $0xc8] sm:$0xff]  }
  0x12   : > { %1897 = vmatmul.mubr.msk.bf16.vlgmr.msra.gmra.mrb[0].mxu1 %vm237_vm3, %v2608_v18  ;;  %2179 = vmatpush3.bf16.msra.mxu0 %v2417_v31  ;;  %v2434_v54 = vld [vmem:[%s3113_s3 + $0x38] sm:$0xff]   ;;  %v2436_v56 = vld [vmem:[%s3113_s3 + $0x80] sm:$0xff]   ;;  %v2439_v58 = vld [vmem:[%s3113_s3 + $0x88] sm:$0xff]  }
  0x13   : > { %382 = vmatpush1.bf16.msra.mxu1 %v2397_v19  ;;  %320 = vmatprep.mubr.bf16.mxu1 %v2512_v7  ;;  %v2440_v59 = vld [vmem:[%s3113_s3 + $0xd0] sm:$0xff]   ;;  %v2443_v61 = vld [vmem:[%s3113_s3 + $0xd8] sm:$0xff]   ;;  %v2445_v63 = vld [vmem:[%s3113_s3 + $0xe0] sm:$0xff]  }
  0x14   : > { %383 = vmatprep.subr.bf16.mxu1 %v2403_v20  ;;  %2180 = vmatprep.subr.bf16.mxu0 %v2513_v15  ;;  %v2441_v60 = vld [vmem:[%s3113_s3 + $0x90] sm:$0xff]   ;;  %v2444_v62 = vld [vmem:[%s3113_s3 + $0x98] sm:$0xff]   ;;  %v2446_v2 = vld [vmem:[%s3113_s3 + $0xa0] sm:$0xff]  }
  0x15   : > { %v2448_v3 = vld [vmem:[%s3113_s3 + $0xe8] sm:$0xff]   ;;  %v2450_v5 = vld [vmem:[%s3113_s3 + $0xf0] sm:$0xff]   ;;  %v2454_v8 = vld [vmem:[%s3113_s3 + $0xb8] sm:$0xff]  }
  0x16   : > { %2181 = vmatpush3.bf16.msra.mxu0 %v276_v33  ;;  %v2449_v4 = vld [vmem:[%s3113_s3 + $0xa8] sm:$0xff]   ;;  %v2451_v6 = vld [vmem:[%s3113_s3 + $0xb0] sm:$0xff]   ;;  %v2812_v12 = vld [vmem:[%s3112_s2] sm:$0x1f] }
  0x17   : > { %384 = vmatpush1.bf16.msra.mxu1 %v2401_v21  ;;  %2070 = vmatprep.subr.bf16.mxu0 %v2435_v55  ;;  %v2816_v14 = vrot.slane %v2812_v12, %v80_v11  ;;  %v2819_v16 = vrot.slane %v2812_v12, %v84_v13 }
  0x18   : > { %385 = vmatprep.subr.bf16.mxu1 %v2408_v22 }
  0x19   : > { %2183 = vmatmul.mubr.msk.bf16.vlgmr.msra.gmra.mrb[0].mxu0 %vm237_vm3, %v2608_v18 }
  0x1a   : > { %1898 = vmatmul.mubr.msk.bf16.gmra.mrb[4].mxu1 %vm237_vm3, %v2400_v28  ;;  %2186 = vmatprep.mubr.msk.bf16.mxu0 %vm2514_vm2, %v2513_v15 }
  0x1b   : > { %330 = vmatprep.mubr.bf16.mxu1 %v2512_v7  ;;  %386 = vmatpush1.bf16.msra.mxu1 %v2406_v26 }
  0x1c   : > { %387 = vmatprep.subr.bf16.mxu1 %v273_v30  ;;  %2071 = vmatpush3.bf16.msra.mxu0 %v2436_v56 }
  0x1d   : > { %2072 = vmatprep.subr.bf16.mxu0 %v2438_v57 }
  0x1f   : > { %388 = vmatpush1.bf16.msra.mxu1 %v270_v32  ;;  %v2437_v32 = vld [vmem:[%s3113_s3 + $0x100] sm:$0xff]  }
  0x20   : > { %2012 = vmatprep.subr.bf16.mxu1 %v2419_v34  ;;  %2073 = vmatpush3.bf16.msra.mxu0 %v2439_v58 }
  0x21   : > { %2187 = vmatmul.mubr.msk.bf16.gmra.mrb[4].mxu0 %vm237_vm3, %v2400_v28  ;;  %2074 = vmatprep.subr.bf16.mxu0 %v2440_v59 }
  0x22   : > { %1899 = vmatmul.mubr.msk.bf16.gmra.mrb[8].mxu1 %vm237_vm3, %v2404_v35  ;;  %2190 = vmatprep.mubr.msk.bf16.mxu0 %vm2514_vm2, %v2513_v15 }
  0x23   : > { %340 = vmatprep.mubr.bf16.mxu1 %v2512_v7 }
  0x24   : > { %2075 = vmatpush3.bf16.msra.mxu0 %v2441_v60 }
  0x25   : > { %2076 = vmatprep.subr.bf16.mxu0 %v2443_v61 }
  0x28   : > { %2077 = vmatpush3.bf16.msra.mxu0 %v2444_v62 }
  0x29   : > { %2191 = vmatmul.mubr.msk.bf16.gmra.mrb[8].mxu0 %vm237_vm3, %v2404_v35  ;;  %2078 = vmatprep.subr.bf16.mxu0 %v2445_v63  ;;  %v2452_v63 = vld [vmem:[%s3113_s3 + $0x118] sm:$0xff]  }
  0x2a   : > { %1900 = vmatmul.mubr.msk.bf16.gmra.mrb[12].mxu1 %vm237_vm3, %v2405_v36  ;;  %2194 = vmatprep.mubr.msk.bf16.mxu0 %vm2514_vm2, %v2513_v15 }
  0x2b   : > { %350 = vmatprep.mubr.bf16.mxu1 %v2512_v7 }
  0x2c   : > { %2079 = vmatpush3.bf16.msra.mxu0 %v2446_v2 }
  0x2d   : > { %2080 = vmatprep.subr.bf16.mxu0 %v2448_v3 }
  0x30   : > { %2081 = vmatpush3.bf16.msra.mxu0 %v2449_v4 }
  0x31   : > { %2195 = vmatmul.mubr.msk.bf16.gmra.mrb[12].mxu0 %vm237_vm3, %v2405_v36  ;;  %2082 = vmatprep.subr.bf16.mxu0 %v2450_v5 }
  0x32   : > { %1901 = vmatmul.mubr.msk.bf16.gmra.mrb[16].mxu1 %vm237_vm3, %v2409_v37  ;;  %2198 = vmatprep.mubr.msk.bf16.mxu0 %vm2514_vm2, %v2513_v15 }
  0x33   : > { %360 = vmatprep.mubr.bf16.mxu1 %v2512_v7 }
  0x34   : > { %2083 = vmatpush3.bf16.msra.mxu0 %v2451_v6 }
  0x39   : > { %2199 = vmatmul.mubr.msk.bf16.gmra.mrb[16].mxu0 %vm237_vm3, %v2409_v37 }
  0x3a   : > { %1902 = vmatmul.mubr.msk.bf16.gmra.mrb[20].mxu1 %vm237_vm3, %v2410_v38  ;;  %2202 = vmatprep.mubr.msk.bf16.mxu0 %vm2514_vm2, %v2513_v15 }
  0x3b   : > { %370 = vmatprep.mubr.bf16.mxu1 %v2512_v7 }
  0x41   : > { %2203 = vmatmul.mubr.msk.bf16.gmra.mrb[20].mxu0 %vm237_vm3, %v2410_v38 }
  0x42   : > { %1903 = vmatmul.mubr.msk.bf16.gmra.mrb[24].mxu1 %vm237_vm3, %v2415_v39  ;;  %2206 = vmatprep.mubr.msk.bf16.mxu0 %vm2514_vm2, %v2513_v15 }
  0x43   : > { %413 = vmatprep.mubr.bf16.mxu1 %v2512_v7 }
  0x49   : > { %2207 = vmatmul.mubr.msk.bf16.gmra.mrb[24].mxu0 %vm237_vm3, %v2415_v39 }
  0x4a   : > { %1904 = vmatmul.mubr.msk.bf16.vlgmr.msra.gmra.mrb[28].mxu1 %vm237_vm3, %v2608_v18 }
  0x4b   : > { %423 = vmatprep.mubr.bf16.mxu1 %v2512_v7  ;;  %2013 = vmatpush3.bf16.msra.mxu1 %v2420_v40 }
  0x4c   : > { %2014 = vmatprep.subr.bf16.mxu1 %v2421_v41  ;;  %v2442_v41 = vld [vmem:[%s3113_s3 + $0x108] sm:$0xff]  }
  0x4f   : > { %2015 = vmatpush3.bf16.msra.mxu1 %v2422_v42 }
  0x50   : > { %2016 = vmatprep.subr.bf16.mxu1 %v2423_v43 }
  0x52   : > { %1905 = vmatmul.mubr.msk.bf16.gmra.mrb[32].mxu1 %vm237_vm3, %v2400_v28 }
  0x53   : > { %433 = vmatprep.mubr.bf16.mxu1 %v2512_v7  ;;  %2017 = vmatpush3.bf16.msra.mxu1 %v2424_v44 }
  0x54   : > { %2018 = vmatprep.subr.bf16.mxu1 %v2425_v45 }
  0x57   : > { %2019 = vmatpush3.bf16.msra.mxu1 %v2426_v46 }
  0x58   : > { %2020 = vmatprep.subr.bf16.mxu1 %v2427_v47 }
  0x5a   : > { %1906 = vmatmul.mubr.msk.bf16.gmra.mrb[36].mxu1 %vm237_vm3, %v2404_v35 }
  0x5b   : > { %443 = vmatprep.mubr.bf16.mxu1 %v2512_v7  ;;  %2021 = vmatpush3.bf16.msra.mxu1 %v2428_v48 }
  0x5c   : > { %2022 = vmatprep.subr.bf16.mxu1 %v2429_v49 }
  0x5f   : > { %2023 = vmatpush3.bf16.msra.mxu1 %v2430_v50  ;;  %v2447_v50 = vld [vmem:[%s3113_s3 + $0x110] sm:$0xff]  }
  0x60   : > { %2024 = vmatprep.subr.bf16.mxu1 %v2431_v51 }
  0x62   : > { %1907 = vmatmul.mubr.msk.bf16.gmra.mrb[40].mxu1 %vm237_vm3, %v2405_v36 }
  0x63   : > { %453 = vmatprep.mubr.bf16.mxu1 %v2512_v7  ;;  %2025 = vmatpush3.bf16.msra.mxu1 %v2432_v52 }
  0x64   : > { %2026 = vmatprep.subr.bf16.mxu1 %v2433_v53 }
  0x67   : > { %2027 = vmatpush3.bf16.msra.mxu1 %v2434_v54 }
  0x68   : > { %2210 = vmatprep.subr.bf16.mxu1 %v2513_v15 }
  0x6a   : > { %1908 = vmatmul.mubr.msk.bf16.gmra.mrb[44].mxu1 %vm237_vm3, %v2409_v37  ;;  %v96_v37 = vsub.s32 4, %v2806_v10 }
  0x6b   : > { %463 = vmatprep.mubr.bf16.mxu1 %v2512_v7 }
  0x6c   : > { %v2838_v46 = vrot.slane %v2812_v12, %v96_v37 }
  0x72   : > { %1909 = vmatmul.mubr.msk.bf16.gmra.mrb[48].mxu1 %vm237_vm3, %v2410_v38 }
  0x73   : > { %473 = vmatprep.mubr.bf16.mxu1 %v2512_v7  ;;  %v2453_v7 = vld [vmem:[%s3113_s3 + $0xf8] sm:$0xff]  }
  0x74   : > { %2084 = vmatprep.subr.bf16.mxu0 %v2453_v7 }
  0x75   : > { %2085 = vmatpush3.bf16.msra.mxu0 %v2454_v8 }
  0x76   : > { %2246 = vmatprep.subr.bf16.mxu0 %v2513_v15 }
  0x7a   : > { %1910 = vmatmul.mubr.msk.bf16.gmra.mrb[52].mxu1 %vm237_vm3, %v2415_v39 }
  0xe5   : > { %v312_v17 = vpop.f32.mrb[0].mxu1 }
  0xe6   : > { %v313_v18 = vadd.f32 %v312_v17, %v2816_v14  ;;  %v314_v19 = vpop.f32.mrb[1].mxu1 }
  0xe7   : > { %v315_v20 = vadd.f32 %v314_v19, %v2819_v16  ;;  %v316_v21 = vpop.f32.mrb[2].mxu1 }
  0xe8   : > { %v317_v22 = vadd.f32 %v316_v21, %v2816_v14  ;;  %v318_v23 = vpop.f32.mrb[3].mxu1  ;;  %v573_v25 = vmax.f32 %v313_v18, 0.0 }
  0xe9   : > { %v319_v24 = vadd.f32 %v318_v23, %v2819_v16  ;;  %v574_v27 = vmax.f32 %v315_v20, 0.0 }
  0xea   : > { %v578_v26 = vmax.f32 %v317_v22, 0.0 }
  0xeb   : > { %v579_v28 = vmax.f32 %v319_v24, 0.0 }
  0xec   : > { %v643_v29 = vpack.c.bf16 %v578_v26, %v573_v25  ;;  %v518_v53 = vpop.f32.mrb[0].mxu0 }
  0xed   : > { %v644_v30 = vpack.c.bf16 %v579_v28, %v574_v27  ;;  %v322_v31 = vpop.f32.mrb[4].mxu1  ;;  %v519_v56 = vadd.f32 %v518_v53, %v2838_v46  ;;  %v2184_v57 = vpop.f32.mrb[1].mxu0 }
  0xee   : > { %v323_v33 = vadd.f32 %v322_v31, %v2816_v14  ;;  %v324_v34 = vpop.f32.mrb[5].mxu1  ;;  %v521_v60 = vpop.f32.mrb[2].mxu0 }
  0xef   : > { %v325_v35 = vadd.f32 %v324_v34, %v2819_v16  ;;  %v326_v36 = vpop.f32.mrb[6].mxu1  ;;  %1027 = vmatprep.mubr.bf16.mxu1 %v644_v30  ;;  %v577_v62 = vmax.f32 %v519_v56, 0.0  ;;  %v522_v2 = vadd.f32 %v521_v60, %v2838_v46  ;;  %v2185_v3 = vpop.f32.mrb[3].mxu0 }
  0xf0   : > { %v327_v38 = vadd.f32 %v326_v36, %v2816_v14  ;;  %v328_v39 = vpop.f32.mrb[7].mxu1  ;;  %1028 = vmatmul.mubr.bf16.vlgmr.msra.gmra.mrb[56].mxu1 %v643_v29  ;;  %v583_v42 = vmax.f32 %v323_v33, 0.0 }
  0xf1   : > { %v329_v40 = vadd.f32 %v328_v39, %v2819_v16  ;;  %2211 = vmatpush3.bf16.msra.mxu1 %v2437_v32  ;;  %v584_v44 = vmax.f32 %v325_v35, 0.0  ;;  %v582_v8 = vmax.f32 %v522_v2, 0.0 }
  0xf2   : > { %v588_v43 = vmax.f32 %v327_v38, 0.0  ;;  %2212 = vmatprep.subr.bf16.mxu1 %v2513_v15 }
  0xf3   : > { %v589_v45 = vmax.f32 %v329_v40, 0.0  ;;  %v2854_v18 = vpack.c.bf16 %v582_v8, %v577_v62 }
  0xf4   : > { %v648_v47 = vpack.c.bf16 %v588_v43, %v583_v42  ;;  %v526_v21 = vpop.f32.mrb[4].mxu0 }
  0xf5   : > { %v649_v48 = vpack.c.bf16 %v589_v45, %v584_v44  ;;  %v332_v49 = vpop.f32.mrb[8].mxu1  ;;  %2213 = vmatpush3.bf16.msra.mxu1 %v2442_v41  ;;  %v527_v24 = vadd.f32 %v526_v21, %v2838_v46  ;;  %v2188_v25 = vpop.f32.mrb[5].mxu0 }
  0xf6   : > { %v333_v51 = vadd.f32 %v332_v49, %v2816_v14  ;;  %v334_v52 = vpop.f32.mrb[9].mxu1  ;;  %2214 = vmatprep.subr.bf16.mxu1 %v2513_v15  ;;  %v529_v28 = vpop.f32.mrb[6].mxu0 }
  0xf7   : > { %v335_v54 = vadd.f32 %v334_v52, %v2819_v16  ;;  %v336_v55 = vpop.f32.mrb[10].mxu1  ;;  %1035 = vmatprep.mubr.bf16.mxu1 %v649_v48  ;;  %v587_v30 = vmax.f32 %v527_v24, 0.0  ;;  %v530_v31 = vadd.f32 %v529_v28, %v2838_v46  ;;  %v2189_v32 = vpop.f32.mrb[7].mxu0 }
  0xf8   : > { %v337_v58 = vadd.f32 %v336_v55, %v2816_v14  ;;  %v338_v59 = vpop.f32.mrb[11].mxu1  ;;  %1036 = vmatmul.mubr.bf16.gmra.mrb[60].mxu1 %v648_v47  ;;  %v593_v4 = vmax.f32 %v333_v51, 0.0 }
  0xf9   : > { %v339_v61 = vadd.f32 %v338_v59, %v2819_v16  ;;  %2215 = vmatpush3.bf16.msra.mxu1 %v2447_v50  ;;  %v594_v6 = vmax.f32 %v335_v54, 0.0  ;;  %v592_v37 = vmax.f32 %v530_v31, 0.0 }
  0xfa   : > { %v598_v5 = vmax.f32 %v337_v58, 0.0  ;;  %2216 = vmatprep.subr.bf16.mxu1 %v2513_v15 }
  0xfb   : > { %v599_v7 = vmax.f32 %v339_v61, 0.0  ;;  %v2862_v41 = vpack.c.bf16 %v592_v37, %v587_v30 }
  0xfc   : > { %v653_v11 = vpack.c.bf16 %v598_v5, %v593_v4  ;;  %v534_v44 = vpop.f32.mrb[8].mxu0 }
  0xfd   : > { %v654_v13 = vpack.c.bf16 %v599_v7, %v594_v6  ;;  %v342_v17 = vpop.f32.mrb[12].mxu1  ;;  %2217 = vmatpush3.bf16.msra.mxu1 %v2452_v63  ;;  %v535_v48 = vadd.f32 %v534_v44, %v2838_v46  ;;  %v2192_v49 = vpop.f32.mrb[9].mxu0 }
  0xfe   : > { %v343_v19 = vadd.f32 %v342_v17, %v2816_v14  ;;  %v344_v20 = vpop.f32.mrb[13].mxu1  ;;  %v537_v52 = vpop.f32.mrb[10].mxu0 }
  0xff   : > { %v345_v22 = vadd.f32 %v344_v20, %v2819_v16  ;;  %v346_v23 = vpop.f32.mrb[14].mxu1  ;;  %1043 = vmatprep.mubr.bf16.mxu1 %v654_v13  ;;  %v597_v54 = vmax.f32 %v535_v48, 0.0  ;;  %v538_v55 = vadd.f32 %v537_v52, %v2838_v46  ;;  %v2193_v56 = vpop.f32.mrb[11].mxu0 }
 0x100   : > { %v347_v26 = vadd.f32 %v346_v23, %v2816_v14  ;;  %v348_v27 = vpop.f32.mrb[15].mxu1  ;;  %1044 = vmatmul.mubr.bf16.gmra.mrb[64].mxu1 %v653_v11  ;;  %v603_v33 = vmax.f32 %v343_v19, 0.0 }
 0x101   : > { %v349_v29 = vadd.f32 %v348_v27, %v2819_v16  ;;  %v604_v35 = vmax.f32 %v345_v22, 0.0  ;;  %v602_v61 = vmax.f32 %v538_v55, 0.0 }
 0x102   : > { %v608_v34 = vmax.f32 %v347_v26, 0.0 }
 0x103   : > { %v609_v36 = vmax.f32 %v349_v29, 0.0  ;;  %v2870_v3 = vpack.c.bf16 %v602_v61, %v597_v54 }
 0x104   : > { %v658_v38 = vpack.c.bf16 %v608_v34, %v603_v33  ;;  %v542_v6 = vpop.f32.mrb[12].mxu0 }
 0x105   : > { %v659_v39 = vpack.c.bf16 %v609_v36, %v604_v35  ;;  %v352_v40 = vpop.f32.mrb[16].mxu1  ;;  %v543_v11 = vadd.f32 %v542_v6, %v2838_v46  ;;  %v2196_v13 = vpop.f32.mrb[13].mxu0  ;;  %v88_v36 = vsub.s32 2, %v2806_v10 }
 0x106   : > { %v353_v42 = vadd.f32 %v352_v40, %v2816_v14  ;;  %v354_v43 = vpop.f32.mrb[17].mxu1  ;;  %v545_v20 = vpop.f32.mrb[14].mxu0  ;;  %v92_v40 = vsub.s32 3, %v2806_v10 }
 0x107   : > { %v355_v45 = vadd.f32 %v354_v43, %v2819_v16  ;;  %v356_v47 = vpop.f32.mrb[18].mxu1  ;;  %1051 = vmatprep.mubr.bf16.mxu1 %v659_v39  ;;  %v607_v22 = vmax.f32 %v543_v11, 0.0  ;;  %v546_v23 = vadd.f32 %v545_v20, %v2838_v46  ;;  %v2197_v24 = vpop.f32.mrb[15].mxu0  ;;  %v2889_v54 = vrot.slane %v2812_v12, %v88_v36 }
 0x108   : > { %v357_v50 = vadd.f32 %v356_v47, %v2816_v14  ;;  %v358_v51 = vpop.f32.mrb[19].mxu1  ;;  %1052 = vmatmul.mubr.bf16.gmra.mrb[68].mxu1 %v658_v38  ;;  %v613_v57 = vmax.f32 %v353_v42, 0.0  ;;  %v2892_v56 = vrot.slane %v2812_v12, %v92_v40 }
 0x109   : > { %v359_v53 = vadd.f32 %v358_v51, %v2819_v16  ;;  %v614_v59 = vmax.f32 %v355_v45, 0.0  ;;  %v612_v29 = vmax.f32 %v546_v23, 0.0 }
 0x10a   : > { %v618_v58 = vmax.f32 %v357_v50, 0.0 }
 0x10b   : > { %v619_v60 = vmax.f32 %v359_v53, 0.0  ;;  %v2878_v33 = vpack.c.bf16 %v612_v29, %v607_v22 }
 0x10c   : > { %v663_v62 = vpack.c.bf16 %v618_v58, %v613_v57  ;;  %v550_v37 = vpop.f32.mrb[16].mxu0 }
 0x10d   : > { %v664_v63 = vpack.c.bf16 %v619_v60, %v614_v59  ;;  %v362_v2 = vpop.f32.mrb[20].mxu1  ;;  %v551_v42 = vadd.f32 %v550_v37, %v2838_v46  ;;  %v2200_v43 = vpop.f32.mrb[17].mxu0 }
 0x10e   : > { %v363_v4 = vadd.f32 %v362_v2, %v2816_v14  ;;  %v364_v5 = vpop.f32.mrb[21].mxu1  ;;  %v553_v47 = vpop.f32.mrb[18].mxu0 }
 0x10f   : > { %v365_v7 = vadd.f32 %v364_v5, %v2819_v16  ;;  %v366_v8 = vpop.f32.mrb[22].mxu1  ;;  %1059 = vmatprep.mubr.bf16.mxu1 %v664_v63  ;;  %v617_v49 = vmax.f32 %v551_v42, 0.0  ;;  %v554_v50 = vadd.f32 %v553_v47, %v2838_v46  ;;  %v2201_v51 = vpop.f32.mrb[19].mxu0 }
 0x110   : > { %v367_v17 = vadd.f32 %v366_v8, %v2816_v14  ;;  %v368_v19 = vpop.f32.mrb[23].mxu1  ;;  %1060 = vmatmul.mubr.bf16.gmra.mrb[72].mxu1 %v663_v62  ;;  %v623_v25 = vmax.f32 %v363_v4, 0.0 }
 0x111   : > { %v369_v21 = vadd.f32 %v368_v19, %v2819_v16  ;;  %v624_v27 = vmax.f32 %v365_v7, 0.0 }
 0x112   : > { %v628_v26 = vmax.f32 %v367_v17, 0.0 }
 0x113   : > { %v629_v28 = vmax.f32 %v369_v21, 0.0 }
 0x114   : > { %v668_v30 = vpack.c.bf16 %v628_v26, %v623_v25  ;;  %v558_v62 = vpop.f32.mrb[20].mxu0 }
 0x115   : > { %v669_v31 = vpack.c.bf16 %v629_v28, %v624_v27  ;;  %v372_v32 = vpop.f32.mrb[24].mxu1  ;;  %v559_v4 = vadd.f32 %v558_v62, %v2838_v46  ;;  %v2204_v5 = vpop.f32.mrb[21].mxu0 }
 0x116   : > { %v373_v34 = vadd.f32 %v372_v32, %v2816_v14  ;;  %v374_v35 = vpop.f32.mrb[25].mxu1  ;;  %v561_v7 = vpop.f32.mrb[22].mxu0 }
 0x117   : > { %v375_v38 = vadd.f32 %v374_v35, %v2819_v16  ;;  %v376_v39 = vpop.f32.mrb[26].mxu1  ;;  %1067 = vmatprep.mubr.bf16.mxu1 %v669_v31  ;;  %v627_v11 = vmax.f32 %v559_v4, 0.0  ;;  %v562_v13 = vadd.f32 %v561_v7, %v2838_v46  ;;  %v2205_v17 = vpop.f32.mrb[23].mxu0 }
 0x118   : > { %v377_v44 = vadd.f32 %v376_v39, %v2816_v14  ;;  %v378_v45 = vpop.f32.mrb[27].mxu1  ;;  %1068 = vmatmul.mubr.bf16.gmra.mrb[76].mxu1 %v668_v30  ;;  %v633_v52 = vmax.f32 %v373_v34, 0.0  ;;  %v622_v14 = vmax.f32 %v554_v50, 0.0 }
 0x119   : > { %v379_v48 = vadd.f32 %v378_v45, %v2819_v16  ;;  %v634_v10 = vmax.f32 %v375_v38, 0.0  ;;  %v632_v23 = vmax.f32 %v562_v13, 0.0 }
 0x11a   : > { %v638_v53 = vmax.f32 %v377_v44, 0.0  ;;  %v2894_v60 = vpack.c.bf16 %v622_v14, %v617_v49 }
 0x11b   : > { %v639_v55 = vmax.f32 %v379_v48, 0.0  ;;  %v2904_v27 = vpack.c.bf16 %v632_v23, %v627_v11 }
 0x11c   : > { %v673_v57 = vpack.c.bf16 %v638_v53, %v633_v52  ;;  %v566_v30 = vpop.f32.mrb[24].mxu0 }
 0x11d   : > { %v674_v58 = vpack.c.bf16 %v639_v55, %v634_v10  ;;  %v415_v59 = vpop.f32.mrb[28].mxu1  ;;  %v567_v34 = vadd.f32 %v566_v30, %v2838_v46  ;;  %v2208_v35 = vpop.f32.mrb[25].mxu0 }
 0x11e   : > { %v416_v16 = vadd.f32 %v415_v59, %v2889_v54  ;;  %v417_v61 = vpop.f32.mrb[29].mxu1  ;;  %v569_v39 = vpop.f32.mrb[26].mxu0 }
 0x11f   : > { %v418_v63 = vadd.f32 %v417_v61, %v2892_v56  ;;  %v419_v2 = vpop.f32.mrb[30].mxu1  ;;  %1075 = vmatprep.mubr.bf16.mxu1 %v674_v58  ;;  %v637_v43 = vmax.f32 %v567_v34, 0.0  ;;  %v570_v44 = vadd.f32 %v569_v39, %v2838_v46  ;;  %v2209_v45 = vpop.f32.mrb[27].mxu0 }
 0x120   : > { %v420_v12 = vadd.f32 %v419_v2, %v2889_v54  ;;  %v421_v6 = vpop.f32.mrb[31].mxu1  ;;  %1076 = vmatmul.mubr.bf16.gmra.mrb[80].mxu1 %v673_v57  ;;  %v575_v19 = vmax.f32 %v416_v16, 0.0 }
 0x121   : > { %v422_v8 = vadd.f32 %v421_v6, %v2892_v56  ;;  %2218 = vmatprep.mubr.msk.bf16.mxu1 %vm2514_vm2, %v2513_v15  ;;  %v576_v21 = vmax.f32 %v418_v63, 0.0  ;;  %v642_v49 = vmax.f32 %v570_v44, 0.0 }
 0x122   : > { %v580_v20 = vmax.f32 %v420_v12, 0.0 }
 0x123   : > { %v581_v22 = vmax.f32 %v422_v8, 0.0  ;;  %v2916_v53 = vpack.c.bf16 %v642_v49, %v637_v43 }
 0x124   : > { %v645_v24 = vpack.c.bf16 %v580_v20, %v575_v19 }
 0x125   : > { %v646_v25 = vpack.c.bf16 %v581_v22, %v576_v21  ;;  %v425_v26 = vpop.f32.mrb[32].mxu1 }
 0x126   : > { %v426_v28 = vadd.f32 %v425_v26, %v2889_v54  ;;  %v427_v29 = vpop.f32.mrb[33].mxu1 }
 0x127   : > { %v428_v31 = vadd.f32 %v427_v29, %v2892_v56  ;;  %v429_v32 = vpop.f32.mrb[34].mxu1  ;;  %1116 = vmatprep.mubr.bf16.mxu0 %v646_v25 }
 0x128   : > { %v585_v36 = vmax.f32 %v426_v28, 0.0  ;;  %v430_v37 = vadd.f32 %v429_v32, %v2889_v54  ;;  %v431_v38 = vpop.f32.mrb[35].mxu1  ;;  %1117 = vmatmul.mubr.bf16.vlgmr.msra.gmra.mrb[28].mxu0 %v645_v24  ;;  %2219 = vmatmul.mubr.msk.bf16.vlgmr.msra.gmra.mrb[84].mxu1 %vm973_vm4, %v2854_v18 }
 0x129   : > { %v586_v40 = vmax.f32 %v428_v31, 0.0  ;;  %v432_v42 = vadd.f32 %v431_v38, %v2892_v56  ;;  %2222 = vmatprep.mubr.msk.bf16.mxu1 %vm2514_vm2, %v2513_v15 }
 0x12a   : > { %v590_v47 = vmax.f32 %v430_v37, 0.0 }
 0x12b   : > { %v591_v48 = vmax.f32 %v432_v42, 0.0 }
 0x12c   : > { %v650_v50 = vpack.c.bf16 %v590_v47, %v585_v36 }
 0x12d   : > { %v651_v51 = vpack.c.bf16 %v591_v48, %v586_v40  ;;  %v435_v52 = vpop.f32.mrb[36].mxu1 }
 0x12e   : > { %v436_v18 = vadd.f32 %v435_v52, %v2889_v54  ;;  %v437_v10 = vpop.f32.mrb[37].mxu1 }
 0x12f   : > { %v438_v55 = vadd.f32 %v437_v10, %v2892_v56  ;;  %v439_v14 = vpop.f32.mrb[38].mxu1  ;;  %1124 = vmatprep.mubr.bf16.mxu0 %v651_v51 }
 0x130   : > { %v595_v57 = vmax.f32 %v436_v18, 0.0  ;;  %v440_v58 = vadd.f32 %v439_v14, %v2889_v54  ;;  %v441_v46 = vpop.f32.mrb[39].mxu1  ;;  %1125 = vmatmul.mubr.bf16.gmra.mrb[32].mxu0 %v650_v50  ;;  %2223 = vmatmul.mubr.msk.bf16.gmra.mrb[88].mxu1 %vm973_vm4, %v2862_v41 }
 0x131   : > { %v596_v59 = vmax.f32 %v438_v55, 0.0  ;;  %v442_v16 = vadd.f32 %v441_v46, %v2892_v56  ;;  %2226 = vmatprep.mubr.msk.bf16.mxu1 %vm2514_vm2, %v2513_v15 }
 0x132   : > { %v600_v61 = vmax.f32 %v440_v58, 0.0 }
 0x133   : > { %v601_v62 = vmax.f32 %v442_v16, 0.0 }
 0x134   : > { %v655_v63 = vpack.c.bf16 %v600_v61, %v595_v57  ;;  %v2455_v61 = vld [vmem:[%s2673_s8] sm:$0xff]  }
 0x135   : > { %v656_v2 = vpack.c.bf16 %v601_v62, %v596_v59  ;;  %v445_v4 = vpop.f32.mrb[40].mxu1  ;;  %2247 = vmatpush3.bf16.msra.mxu0 %v2455_v61 }
 0x136   : > { %v446_v5 = vadd.f32 %v445_v4, %v2889_v54  ;;  %v447_v12 = vpop.f32.mrb[41].mxu1  ;;  %2248 = vmatprep.subr.bf16.mxu0 %v2513_v15  ;;  %v2458_v4 = vld [vmem:[%s2673_s8 + $0x18] sm:$0xff]  }
 0x137   : > { %v448_v6 = vadd.f32 %v447_v12, %v2892_v56  ;;  %v449_v7 = vpop.f32.mrb[42].mxu1  ;;  %1132 = vmatprep.mubr.bf16.mxu0 %v656_v2 }
 0x138   : > { %v605_v8 = vmax.f32 %v446_v5, 0.0  ;;  %v450_v41 = vadd.f32 %v449_v7, %v2889_v54  ;;  %v451_v11 = vpop.f32.mrb[43].mxu1  ;;  %1133 = vmatmul.mubr.bf16.gmra.mrb[36].mxu0 %v655_v63  ;;  %2227 = vmatmul.mubr.msk.bf16.gmra.mrb[92].mxu1 %vm973_vm4, %v2870_v3 }
 0x139   : > { %v606_v13 = vmax.f32 %v448_v6, 0.0  ;;  %v452_v17 = vadd.f32 %v451_v11, %v2892_v56  ;;  %2230 = vmatprep.mubr.msk.bf16.mxu1 %vm2514_vm2, %v2513_v15 }
 0x13a   : > { %v610_v19 = vmax.f32 %v450_v41, 0.0 }
 0x13b   : > { %v611_v20 = vmax.f32 %v452_v17, 0.0 }
 0x13c   : > { %v660_v21 = vpack.c.bf16 %v610_v19, %v605_v8 }
 0x13d   : > { %v661_v22 = vpack.c.bf16 %v611_v20, %v606_v13  ;;  %v455_v23 = vpop.f32.mrb[44].mxu1 }
 0x13e   : > { %v456_v24 = vadd.f32 %v455_v23, %v2889_v54  ;;  %v457_v25 = vpop.f32.mrb[45].mxu1 }
 0x13f   : > { %v458_v26 = vadd.f32 %v457_v25, %v2892_v56  ;;  %v459_v28 = vpop.f32.mrb[46].mxu1  ;;  %1140 = vmatprep.mubr.bf16.mxu0 %v661_v22 }
 0x140   : > { %v615_v29 = vmax.f32 %v456_v24, 0.0  ;;  %v460_v3 = vadd.f32 %v459_v28, %v2889_v54  ;;  %v461_v30 = vpop.f32.mrb[47].mxu1  ;;  %1141 = vmatmul.mubr.bf16.gmra.mrb[40].mxu0 %v660_v21  ;;  %2231 = vmatmul.mubr.msk.bf16.gmra.mrb[96].mxu1 %vm973_vm4, %v2878_v33 }
 0x141   : > { %v616_v31 = vmax.f32 %v458_v26, 0.0  ;;  %v462_v32 = vadd.f32 %v461_v30, %v2892_v56  ;;  %2234 = vmatprep.mubr.msk.bf16.mxu1 %vm2514_vm2, %v2513_v15 }
 0x142   : > { %v620_v34 = vmax.f32 %v460_v3, 0.0 }
 0x143   : > { %v621_v35 = vmax.f32 %v462_v32, 0.0 }
 0x144   : > { %v665_v36 = vpack.c.bf16 %v620_v34, %v615_v29 }
 0x145   : > { %v666_v37 = vpack.c.bf16 %v621_v35, %v616_v31  ;;  %v465_v38 = vpop.f32.mrb[48].mxu1 }
 0x146   : > { %v466_v39 = vadd.f32 %v465_v38, %v2889_v54  ;;  %v467_v40 = vpop.f32.mrb[49].mxu1  ;;  %v2983_v38 = vld [vmem:[%s3114_s4] ss:$0 sm:$0xff] }
 0x147   : > { %v468_v42 = vadd.f32 %v467_v40, %v2892_v56  ;;  %v469_v43 = vpop.f32.mrb[50].mxu1  ;;  %1148 = vmatprep.mubr.bf16.mxu0 %v666_v37 }
 0x148   : > { %v625_v44 = vmax.f32 %v466_v39, 0.0  ;;  %v470_v33 = vadd.f32 %v469_v43, %v2889_v54  ;;  %v471_v45 = vpop.f32.mrb[51].mxu1  ;;  %1149 = vmatmul.mubr.bf16.gmra.mrb[44].mxu0 %v665_v36  ;;  %2235 = vmatmul.mubr.msk.bf16.gmra.mrb[100].mxu1 %vm973_vm4, %v2894_v60 }
 0x149   : > { %v626_v47 = vmax.f32 %v468_v42, 0.0  ;;  %v472_v48 = vadd.f32 %v471_v45, %v2892_v56  ;;  %2238 = vmatprep.mubr.msk.bf16.mxu1 %vm2514_vm2, %v2513_v15 }
 0x14a   : > { %v630_v49 = vmax.f32 %v470_v33, 0.0 }
 0x14b   : > { %v631_v50 = vmax.f32 %v472_v48, 0.0 }
 0x14c   : > { %v670_v51 = vpack.c.bf16 %v630_v49, %v625_v44 }
 0x14d   : > { %v671_v52 = vpack.c.bf16 %v631_v50, %v626_v47  ;;  %v475_v18 = vpop.f32.mrb[52].mxu1 }
 0x14e   : > { %v476_v10 = vadd.f32 %v475_v18, %v2889_v54  ;;  %v477_v55 = vpop.f32.mrb[53].mxu1 }
 0x14f   : > { %v478_v14 = vadd.f32 %v477_v55, %v2892_v56  ;;  %v479_v57 = vpop.f32.mrb[54].mxu1  ;;  %1156 = vmatprep.mubr.bf16.mxu0 %v671_v52 }
 0x150   : > { %v635_v60 = vmax.f32 %v476_v10, 0.0  ;;  %v480_v58 = vadd.f32 %v479_v57, %v2889_v54  ;;  %v481_v46 = vpop.f32.mrb[55].mxu1  ;;  %1157 = vmatmul.mubr.bf16.gmra.mrb[48].mxu0 %v670_v51  ;;  %2239 = vmatmul.mubr.msk.bf16.gmra.mrb[104].mxu1 %vm973_vm4, %v2904_v27  ;;  %v2457_v27 = vld [vmem:[%s2673_s8 + $0x10] sm:$0xff]  }
 0x151   : > { %v636_v59 = vmax.f32 %v478_v14, 0.0  ;;  %v482_v16 = vadd.f32 %v481_v46, %v2892_v56  ;;  %2242 = vmatprep.mubr.msk.bf16.mxu1 %vm2514_vm2, %v2513_v15  ;;  %v2456_v56 = vld [vmem:[%s2673_s8 + $0x8] sm:$0xff]  }
 0x152   : > { %v640_v62 = vmax.f32 %v480_v58, 0.0  ;;  %2249 = vmatpush3.bf16.msra.mxu0 %v2456_v56 }
 0x153   : > { %v641_v63 = vmax.f32 %v482_v16, 0.0  ;;  %2250 = vmatprep.subr.bf16.mxu0 %v2513_v15 }
 0x154   : > { %v675_v2 = vpack.c.bf16 %v640_v62, %v635_v60 }
 0x155   : > { %v676_v54 = vpack.c.bf16 %v641_v63, %v636_v59 }
 0x156   : > { %2251 = vmatpush3.bf16.msra.mxu0 %v2457_v27 }
 0x157   : > { %1164 = vmatprep.mubr.bf16.mxu0 %v676_v54  ;;  %2252 = vmatprep.subr.bf16.mxu0 %v2513_v15 }
 0x158   : > { %1165 = vmatmul.mubr.bf16.gmra.mrb[52].mxu0 %v675_v2  ;;  %2243 = vmatmul.mubr.msk.bf16.gmra.mrb[108].mxu1 %vm973_vm4, %v2916_v53 }
 0x159   : > { %2254 = vmatprep.mubr.msk.bf16.mxu0 %vm2514_vm2, %v2513_v15 }
 0x15a   : > { %2253 = vmatpush3.bf16.msra.mxu0 %v2458_v4 }
 0x15b   : > { %2258 = vmatprep.subr.bf16.mxu0 %v2513_v15 }
 0x1c3   : > { %v2028_v5 = vpop.f32.mrb[56].mxu1 }
 0x1c4   : > { %v2029_v12 = vpop.f32.mrb[57].mxu1 }
 0x1c5   : > { %v2030_v6 = vadd.f32 %v2029_v12, %v2028_v5  ;;  %v2031_v7 = vpop.f32.mrb[58].mxu1 }
 0x1c6   : > { %v2032_v53 = vpop.f32.mrb[59].mxu1 }
 0x1c7   : > { %v2033_v8 = vadd.f32 %v2032_v53, %v2031_v7  ;;  %v1030_v62 = vadd.f32 %v2030_v6, %v2983_v38 }
 0x1c9   : > { %v1033_v4 = vadd.f32 %v2033_v8, %v2983_v38  ;;  %v2459_v8 = vld [vmem:[%s2673_s8 + $0x20] sm:$0xff]  }
 0x1cb   : > { %v2034_v41 = vpop.f32.mrb[60].mxu1 }
 0x1cc   : > { %v2035_v11 = vpop.f32.mrb[61].mxu1 }
 0x1cd   : > { %v2036_v13 = vadd.f32 %v2035_v11, %v2034_v41  ;;  %v2037_v17 = vpop.f32.mrb[62].mxu1 }
 0x1ce   : > { %v2038_v19 = vpop.f32.mrb[63].mxu1 }
 0x1cf   : > { %v2970_v20 = vadd.f32 %v2038_v19, %v2037_v17 }
 0x1d3   : > { %v2040_v21 = vpop.f32.mrb[64].mxu1 }
 0x1d4   : > { %v2041_v22 = vpop.f32.mrb[65].mxu1 }
 0x1d5   : > { %v2972_v23 = vadd.f32 %v2041_v22, %v2040_v21  ;;  %v2043_v24 = vpop.f32.mrb[66].mxu1  ;;  %v1038_v22 = vadd.f32 %v2036_v13, %v2983_v38  ;;  %v2460_v13 = vld [vmem:[%s2673_s8 + $0x28] sm:$0xff]  }
 0x1d6   : > { %v2044_v25 = vpop.f32.mrb[67].mxu1 }
 0x1d7   : > { %v2974_v26 = vadd.f32 %v2044_v25, %v2043_v24 }
 0x1db   : > { %v2046_v28 = vpop.f32.mrb[68].mxu1 }
 0x1dc   : > { %v2047_v29 = vpop.f32.mrb[69].mxu1 }
 0x1dd   : > { %v2976_v3 = vadd.f32 %v2047_v29, %v2046_v28  ;;  %v2049_v30 = vpop.f32.mrb[70].mxu1 }
 0x1de   : > { %v2050_v31 = vpop.f32.mrb[71].mxu1 }
 0x1df   : > { %v2978_v32 = vadd.f32 %v2050_v31, %v2049_v30 }
 0x1e3   : > { %v2052_v34 = vpop.f32.mrb[72].mxu1 }
 0x1e4   : > { %v2053_v35 = vpop.f32.mrb[73].mxu1 }
 0x1e5   : > { %v2054_v36 = vadd.f32 %v2053_v35, %v2052_v34  ;;  %v2055_v37 = vpop.f32.mrb[74].mxu1  ;;  %v1041_v34 = vadd.f32 %v2970_v20, %v2983_v38 }
 0x1e6   : > { %v2056_v39 = vpop.f32.mrb[75].mxu1 }
 0x1e7   : > { %v2986_v40 = vadd.f32 %v2054_v36, %v2983_v38  ;;  %v2057_v42 = vadd.f32 %v2056_v39, %v2055_v37 }
 0x1e9   : > { %v2989_v43 = vadd.f32 %v2057_v42, %v2983_v38 }
 0x1eb   : > { %v2058_v44 = vpop.f32.mrb[76].mxu1 }
 0x1ec   : > { %v2059_v33 = vpop.f32.mrb[77].mxu1 }
 0x1ed   : > { %v2060_v45 = vadd.f32 %v2059_v33, %v2058_v44  ;;  %v2061_v47 = vpop.f32.mrb[78].mxu1 }
 0x1ee   : > { %v2062_v48 = vpop.f32.mrb[79].mxu1 }
 0x1ef   : > { %v2992_v49 = vadd.f32 %v2060_v45, %v2983_v38  ;;  %v2063_v50 = vadd.f32 %v2062_v48, %v2061_v47  ;;  %v1046_v48 = vadd.f32 %v2972_v23, %v2983_v38 }
 0x1f1   : > { %v2995_v51 = vadd.f32 %v2063_v50, %v2983_v38 }
 0x1f3   : > { %v2064_v52 = vpop.f32.mrb[80].mxu1 }
 0x1f4   : > { %v2065_v18 = vpop.f32.mrb[81].mxu1 }
 0x1f5   : > { %v2066_v10 = vadd.f32 %v2065_v18, %v2064_v52  ;;  %v2067_v55 = vpop.f32.mrb[82].mxu1 }
 0x1f6   : > { %v2068_v14 = vpop.f32.mrb[83].mxu1 }
 0x1f7   : > { %v2998_v57 = vadd.f32 %v2066_v10, %v2983_v38  ;;  %v2069_v60 = vadd.f32 %v2068_v14, %v2067_v55 }
 0x1f9   : > { %v3001_v58 = vadd.f32 %v2069_v60, %v2983_v38  ;;  %v2461_v60 = vld [vmem:[%s2673_s8 + $0x30] sm:$0xff]  }
 0x1fb   : > { %v2086_v46 = vpop.f32.mrb[28].mxu0  ;;  %v1207_v59 = vpop.f32.mrb[84].mxu1 }
 0x1fc   : > { %v2087_v16 = vpop.f32.mrb[29].mxu0  ;;  %v2220_v61 = vpop.f32.mrb[85].mxu1 }
 0x1fd   : > { %v2088_v63 = vadd.f32 %v2087_v16, %v2086_v46  ;;  %v2089_v2 = vpop.f32.mrb[30].mxu0  ;;  %v1210_v54 = vpop.f32.mrb[86].mxu1 }
 0x1fe   : > { %v2090_v56 = vpop.f32.mrb[31].mxu0  ;;  %v2221_v27 = vpop.f32.mrb[87].mxu1 }
 0x1ff   : > { %v1119_v5 = vadd.f32 %v2088_v63, %v1030_v62  ;;  %v2091_v12 = vadd.f32 %v2090_v56, %v2089_v2  ;;  %v2462_v2 = vld [vmem:[%s2673_s8 + $0x38] sm:$0xff]  }
 0x201   : > { %v1208_v7 = vadd.f32 %v1207_v59, %v1119_v5  ;;  %v1122_v53 = vadd.f32 %v2091_v12, %v1033_v4  ;;  %v1049_v59 = vadd.f32 %v2974_v26, %v2983_v38  ;;  %v1054_v26 = vadd.f32 %v2976_v3, %v2983_v38 }
 0x203   : > { %v1211_v41 = vadd.f32 %v1210_v54, %v1122_v53  ;;  %v2092_v11 = vpop.f32.mrb[32].mxu0  ;;  %v1215_v17 = vpop.f32.mrb[88].mxu1  ;;  %v1262_v6 = vmax.f32 %v1208_v7, 0.0 }
 0x204   : > { %v2093_v19 = vpop.f32.mrb[33].mxu0  ;;  %v2224_v21 = vpop.f32.mrb[89].mxu1 }
 0x205   : > { %v1263_v24 = vmax.f32 %v1211_v41, 0.0  ;;  %v2094_v25 = vadd.f32 %v2093_v19, %v2092_v11  ;;  %v2095_v28 = vpop.f32.mrb[34].mxu0  ;;  %v1218_v29 = vpop.f32.mrb[90].mxu1  ;;  %v2463_v19 = vld [vmem:[%s2673_s8 + $0x40] sm:$0xff]  }
 0x206   : > { %v2096_v30 = vpop.f32.mrb[35].mxu0  ;;  %v2225_v31 = vpop.f32.mrb[91].mxu1 }
 0x207   : > { %v1276_v35 = vpack.c.bf16 %v1263_v24, %v1262_v6  ;;  %v2097_v36 = vadd.f32 %v2096_v30, %v2095_v28  ;;  %v1127_v37 = vadd.f32 %v2094_v25, %v1038_v22  ;;  %v1057_v22 = vadd.f32 %v2978_v32, %v2983_v38 }
 0x209   : > { %v1216_v39 = vadd.f32 %v1215_v17, %v1127_v37  ;;  %2255 = vmatmul.mubr.msk.bf16.vlgmr.msra.gmra.mrb[56].mxu0 %vm973_vm4, %v1276_v35  ;;  %v1130_v42 = vadd.f32 %v2097_v36, %v1041_v34 }
 0x20a   : > { %2259 = vmatpush3.bf16.msra.mxu0 %v2459_v8  ;;  %2266 = vmatprep.mubr.msk.bf16.mxu0 %vm2514_vm2, %v2513_v15 }
 0x20b   : > { %v1219_v44 = vadd.f32 %v1218_v29, %v1130_v42  ;;  %v2098_v33 = vpop.f32.mrb[36].mxu0  ;;  %2260 = vmatprep.subr.bf16.mxu0 %v2513_v15  ;;  %v1223_v45 = vpop.f32.mrb[92].mxu1  ;;  %v1264_v50 = vmax.f32 %v1216_v39, 0.0  ;;  %v2464_v29 = vld [vmem:[%s2673_s8 + $0x48] sm:$0xff]  }
 0x20c   : > { %v2099_v47 = vpop.f32.mrb[37].mxu0  ;;  %v2228_v20 = vpop.f32.mrb[93].mxu1 }
 0x20d   : > { %v1265_v52 = vmax.f32 %v1219_v44, 0.0  ;;  %v2100_v18 = vadd.f32 %v2099_v47, %v2098_v33  ;;  %v2101_v10 = vpop.f32.mrb[38].mxu0  ;;  %v1226_v55 = vpop.f32.mrb[94].mxu1 }
 0x20e   : > { %2261 = vmatpush3.bf16.msra.mxu0 %v2460_v13  ;;  %v2102_v14 = vpop.f32.mrb[39].mxu0  ;;  %v2229_v46 = vpop.f32.mrb[95].mxu1  ;;  %v2465_v13 = vld [vmem:[%s2673_s8 + $0x50] sm:$0xff]  }
 0x20f   : > { %v1277_v16 = vpack.c.bf16 %v1265_v52, %v1264_v50  ;;  %v2103_v61 = vadd.f32 %v2102_v14, %v2101_v10  ;;  %v1135_v62 = vadd.f32 %v2100_v18, %v1046_v48  ;;  %2262 = vmatprep.subr.bf16.mxu0 %v2513_v15  ;;  %v2466_v50 = vld [vmem:[%s2673_s8 + $0x58] sm:$0xff]  }
 0x211   : > { %v1224_v63 = vadd.f32 %v1223_v45, %v1135_v62  ;;  %v1138_v23 = vadd.f32 %v2103_v61, %v1049_v59  ;;  %v2467_v62 = vld [vmem:[%s2673_s8 + $0x60] sm:$0xff]  }
 0x212   : > { %2263 = vmatpush3.bf16.msra.mxu0 %v2461_v60 }
 0x213   : > { %v1227_v54 = vadd.f32 %v1226_v55, %v1138_v23  ;;  %v2104_v56 = vpop.f32.mrb[40].mxu0  ;;  %2264 = vmatprep.subr.bf16.mxu0 %v2513_v15  ;;  %v1231_v27 = vpop.f32.mrb[96].mxu1  ;;  %v1266_v12 = vmax.f32 %v1224_v63, 0.0 }
 0x214   : > { %v2105_v4 = vpop.f32.mrb[41].mxu0  ;;  %v2232_v5 = vpop.f32.mrb[97].mxu1 }
 0x215   : > { %v1267_v7 = vmax.f32 %v1227_v54, 0.0  ;;  %v2106_v53 = vadd.f32 %v2105_v4, %v2104_v56  ;;  %v2107_v41 = vpop.f32.mrb[42].mxu0  ;;  %v1234_v11 = vpop.f32.mrb[98].mxu1 }
 0x216   : > { %2265 = vmatpush3.bf16.msra.mxu0 %v2462_v2  ;;  %v2108_v17 = vpop.f32.mrb[43].mxu0  ;;  %v2233_v21 = vpop.f32.mrb[99].mxu1 }
 0x217   : > { %v1278_v6 = vpack.c.bf16 %v1267_v7, %v1266_v12  ;;  %v2109_v24 = vadd.f32 %v2108_v17, %v2107_v41  ;;  %v1143_v25 = vadd.f32 %v2106_v53, %v1054_v26  ;;  %2270 = vmatprep.subr.bf16.mxu0 %v2513_v15 }
 0x219   : > { %v1232_v28 = vadd.f32 %v1231_v27, %v1143_v25  ;;  %2267 = vmatmul.mubr.msk.bf16.vlgmr.msra.gmra.mrb[56].mxu0 %vm973_vm4, %v1277_v16  ;;  %v1146_v3 = vadd.f32 %v2109_v24, %v1057_v22  ;;  %v2468_v27 = vld [vmem:[%s2673_s8 + $0x68] sm:$0xff]  }
 0x21a   : > { %2271 = vmatpush3.bf16.msra.mxu0 %v2463_v19  ;;  %2278 = vmatprep.mubr.msk.bf16.mxu0 %vm2514_vm2, %v2513_v15  ;;  %v2469_v19 = vld [vmem:[%s2673_s8 + $0x70] sm:$0xff]  }
 0x21b   : > { %v1235_v30 = vadd.f32 %v1234_v11, %v1146_v3  ;;  %v2110_v8 = vpop.f32.mrb[44].mxu0  ;;  %2272 = vmatprep.subr.bf16.mxu0 %v2513_v15  ;;  %v1239_v32 = vpop.f32.mrb[100].mxu1  ;;  %v1268_v34 = vmax.f32 %v1232_v28, 0.0  ;;  %v2470_v3 = vld [vmem:[%s2673_s8 + $0x78] sm:$0xff]  }
 0x21c   : > { %v2111_v38 = vpop.f32.mrb[45].mxu0  ;;  %v2236_v31 = vpop.f32.mrb[101].mxu1 }
 0x21d   : > { %v1269_v35 = vmax.f32 %v1235_v30, 0.0  ;;  %v2112_v36 = vadd.f32 %v2111_v38, %v2110_v8  ;;  %v2113_v37 = vpop.f32.mrb[46].mxu0  ;;  %v1242_v39 = vpop.f32.mrb[102].mxu1  ;;  %v2474_v31 = vld [vmem:[%s2673_s8 + $0x98] sm:$0xff]  }
 0x21e   : > { %2273 = vmatpush3.bf16.msra.mxu0 %v2464_v29  ;;  %v2114_v42 = vpop.f32.mrb[47].mxu0  ;;  %v2237_v44 = vpop.f32.mrb[103].mxu1 }
 0x21f   : > { %v3034_v33 = vpack.c.bf16 %v1269_v35, %v1268_v34  ;;  %v2115_v45 = vadd.f32 %v2114_v42, %v2113_v37  ;;  %v1151_v47 = vadd.f32 %v2112_v36, %v2986_v40  ;;  %2274 = vmatprep.subr.bf16.mxu0 %v2513_v15  ;;  %v2475_v34 = vld [vmem:[%s2673_s8 + $0xa0] sm:$0xff]   ;;  %v2476_v35 = vld [vmem:[%s2673_s8 + $0xa8] sm:$0xff]   ;;  %v2477_v36 = vld [vmem:[%s2673_s8 + $0xb0] sm:$0xff]  }
 0x220   : > { %v2478_v37 = vld [vmem:[%s2673_s8 + $0xb8] sm:$0xff]   ;;  %v2480_v42 = vld [vmem:[%s2673_s8 + $0xc8] sm:$0xff]  }
 0x221   : > { %v1240_v20 = vadd.f32 %v1239_v32, %v1151_v47  ;;  %v1154_v48 = vadd.f32 %v2115_v45, %v2989_v43  ;;  %v2471_v32 = vld [vmem:[%s2673_s8 + $0x80] sm:$0xff]   ;;  %v2482_v44 = vld [vmem:[%s2673_s8 + $0xd8] sm:$0xff]  }
 0x222   : > { %2275 = vmatpush3.bf16.msra.mxu0 %v2465_v13  ;;  %v2481_v13 = vld [vmem:[%s2673_s8 + $0xd0] sm:$0xff]  }
 0x223   : > { %v1243_v52 = vadd.f32 %v1242_v39, %v1154_v48  ;;  %v2116_v18 = vpop.f32.mrb[48].mxu0  ;;  %2276 = vmatprep.subr.bf16.mxu0 %v2513_v15  ;;  %v1247_v10 = vpop.f32.mrb[104].mxu1  ;;  %v1270_v60 = vmax.f32 %v1240_v20, 0.0  ;;  %v2479_v39 = vld [vmem:[%s2673_s8 + $0xc0] sm:$0xff]  }
 0x224   : > { %v2117_v55 = vpop.f32.mrb[49].mxu0  ;;  %v2240_v14 = vpop.f32.mrb[105].mxu1 }
 0x225   : > { %v1271_v46 = vmax.f32 %v1243_v52, 0.0  ;;  %v2118_v59 = vadd.f32 %v2117_v55, %v2116_v18  ;;  %v2119_v40 = vpop.f32.mrb[50].mxu0  ;;  %v1250_v16 = vpop.f32.mrb[106].mxu1  ;;  %v1842_v18 = vand.u32 (%p29_p0), 127, %v78_v9 }
 0x226   : > { %2277 = vmatpush3.bf16.msra.mxu0 %v2466_v50  ;;  %v2120_v61 = vpop.f32.mrb[51].mxu0  ;;  %v2241_v43 = vpop.f32.mrb[107].mxu1 }
 0x227   : > { %v1280_v63 = vpack.c.bf16 %v1271_v46, %v1270_v60  ;;  %v2121_v23 = vadd.f32 %v2120_v61, %v2119_v40  ;;  %v1159_v2 = vadd.f32 %v2118_v59, %v2992_v49  ;;  %2282 = vmatprep.subr.bf16.mxu0 %v2513_v15  ;;  %vm1843_vm5 = vcmp.eq.s32.totalorder (%p29_p0), %v1842_v18, 14 }
 0x229   : > { %v1248_v54 = vadd.f32 %v1247_v10, %v1159_v2  ;;  %2279 = vmatmul.mubr.msk.bf16.vlgmr.msra.gmra.mrb[56].mxu0 %vm973_vm4, %v1278_v6  ;;  %v1162_v56 = vadd.f32 %v2121_v23, %v2995_v51 }
 0x22a   : > { %2283 = vmatpush3.bf16.msra.mxu0 %v2467_v62  ;;  %2290 = vmatprep.mubr.msk.bf16.mxu0 %vm2514_vm2, %v2513_v15 }
 0x22b   : > { %v1251_v4 = vadd.f32 %v1250_v16, %v1162_v56  ;;  %v2122_v5 = vpop.f32.mrb[52].mxu0  ;;  %2284 = vmatprep.subr.bf16.mxu0 %v2513_v15  ;;  %v1255_v26 = vpop.f32.mrb[108].mxu1  ;;  %v1272_v7 = vmax.f32 %v1248_v54, 0.0 }
 0x22c   : > { %v2123_v12 = vpop.f32.mrb[53].mxu0  ;;  %v2244_v49 = vpop.f32.mrb[109].mxu1 }
 0x22d   : > { %v1273_v53 = vmax.f32 %v1251_v4, 0.0  ;;  %v2124_v41 = vadd.f32 %v2123_v12, %v2122_v5  ;;  %v2125_v11 = vpop.f32.mrb[54].mxu0  ;;  %v1258_v17 = vpop.f32.mrb[110].mxu1 }
 0x22e   : > { %2285 = vmatpush3.bf16.msra.mxu0 %v2468_v27  ;;  %v2126_v51 = vpop.f32.mrb[55].mxu0  ;;  %v2245_v21 = vpop.f32.mrb[111].mxu1 }
 0x22f   : > { %v1281_v22 = vpack.c.bf16 %v1273_v53, %v1272_v7  ;;  %v2127_v6 = vadd.f32 %v2126_v51, %v2125_v11  ;;  %v1167_v24 = vadd.f32 %v2124_v41, %v2998_v57  ;;  %2286 = vmatprep.subr.bf16.mxu0 %v2513_v15  ;;  %v2472_v57 = vld [vmem:[%s2673_s8 + $0x88] sm:$0xff]  }
 0x231   : > { %v1256_v25 = vadd.f32 %v1255_v26, %v1167_v24  ;;  %v1170_v28 = vadd.f32 %v2127_v6, %v3001_v58  ;;  %v2473_v58 = vld [vmem:[%s2673_s8 + $0x90] sm:$0xff]  }
 0x232   : > { %2287 = vmatpush3.bf16.msra.mxu0 %v2469_v19 }
 0x233   : > { %v1259_v29 = vadd.f32 %v1258_v17, %v1170_v28  ;;  %2288 = vmatprep.subr.bf16.mxu0 %v2513_v15  ;;  %v1274_v30 = vmax.f32 %v1256_v25, 0.0 }
 0x235   : > { %v1275_v8 = vmax.f32 %v1259_v29, 0.0 }
 0x236   : > { %2289 = vmatpush3.bf16.msra.mxu0 %v2470_v3 }
 0x237   : > { %v1282_v38 = vpack.c.bf16 %v1275_v8, %v1274_v30  ;;  %2294 = vmatprep.subr.bf16.mxu0 %v2513_v15 }
 0x239   : > { %2291 = vmatmul.mubr.msk.bf16.vlgmr.msra.gmra.mrb[56].mxu0 %vm973_vm4, %v3034_v33 }
 0x23a   : > { %2295 = vmatpush3.bf16.msra.mxu0 %v2471_v32  ;;  %2302 = vmatprep.mubr.msk.bf16.mxu0 %vm2514_vm2, %v2513_v15 }
 0x23b   : > { %2296 = vmatprep.subr.bf16.mxu0 %v2513_v15 }
 0x23e   : > { %2297 = vmatpush3.bf16.msra.mxu0 %v2472_v57 }
 0x23f   : > { %2298 = vmatprep.subr.bf16.mxu0 %v2513_v15 }
 0x242   : > { %2299 = vmatpush3.bf16.msra.mxu0 %v2473_v58 }
 0x243   : > { %2300 = vmatprep.subr.bf16.mxu0 %v2513_v15 }
 0x246   : > { %2301 = vmatpush3.bf16.msra.mxu0 %v2474_v31 }
 0x247   : > { %2306 = vmatprep.subr.bf16.mxu0 %v2513_v15 }
 0x249   : > { %2303 = vmatmul.mubr.msk.bf16.vlgmr.msra.gmra.mrb[56].mxu0 %vm973_vm4, %v1280_v63 }
 0x24a   : > { %2307 = vmatpush3.bf16.msra.mxu0 %v2475_v34  ;;  %2314 = vmatprep.mubr.msk.bf16.mxu0 %vm2514_vm2, %v2513_v15 }
 0x24b   : > { %2308 = vmatprep.subr.bf16.mxu0 %v2513_v15 }
 0x24e   : > { %2309 = vmatpush3.bf16.msra.mxu0 %v2476_v35 }
 0x24f   : > { %2310 = vmatprep.subr.bf16.mxu0 %v2513_v15 }
 0x252   : > { %2311 = vmatpush3.bf16.msra.mxu0 %v2477_v36 }
 0x253   : > { %2312 = vmatprep.subr.bf16.mxu0 %v2513_v15 }
 0x256   : > { %2313 = vmatpush3.bf16.msra.mxu0 %v2478_v37 }
 0x257   : > { %2318 = vmatprep.subr.bf16.mxu0 %v2513_v15 }
 0x259   : > { %2315 = vmatmul.mubr.msk.bf16.vlgmr.msra.gmra.mrb[56].mxu0 %vm973_vm4, %v1281_v22 }
 0x25a   : > { %2319 = vmatpush3.bf16.msra.mxu0 %v2479_v39  ;;  %2326 = vmatprep.mubr.msk.bf16.mxu0 %vm2514_vm2, %v2513_v15 }
 0x25b   : > { %2320 = vmatprep.subr.bf16.mxu0 %v2513_v15 }
 0x25e   : > { %2321 = vmatpush3.bf16.msra.mxu0 %v2480_v42 }
 0x25f   : > { %2322 = vmatprep.subr.bf16.mxu0 %v2513_v15 }
 0x262   : > { %2323 = vmatpush3.bf16.msra.mxu0 %v2481_v13 }
 0x263   : > { %2324 = vmatprep.subr.bf16.mxu0 %v2513_v15  ;;  %v1998_v15 = vld [vmem:[%s3116_s6] ss:$0 sm:$0xff] (%p29_p0) }
 0x266   : > { %2325 = vmatpush3.bf16.msra.mxu0 %v2482_v44 }
 0x269   : > { %2327 = vmatmul.mubr.msk.bf16.vlgmr.msra.gmra.mrb[56].mxu0 %vm973_vm4, %v1282_v38 }
 0x33b   :  { %31 = sbr.rel (!%p29_p0) target bundleno = 1 (0x1), region = 57 }
 0x33c   : > { %v1823_v33 = vpop.f32.mrb[56].mxu0 }
 0x33d   : > { %v2330_v45 = vadd.f32 %v2505_v1, %v1823_v33   ;;  %v2328_v47 = vpop.f32.mrb[57].mxu0 }
 0x33e   : > { %v1826_v20 = vpop.f32.mrb[58].mxu0 }
 0x33f   : > { %v2331_v48 = vadd.f32 %v2501_v0, %v1826_v20   ;;  %v2329_v50 = vpop.f32.mrb[59].mxu0  ;;  %v3119_v1 = vmov %v2330_v45 }
 0x340   :  { %v1839_v1 = vadd.f32 (%p29_p0), %v2330_v45, %v1998_v15 }
 0x341   : > { %v3118_v0 = vmov %v2331_v48  ;;  %v1840_v52 = vadd.f32 (%p29_p0), %v2331_v48, %v1998_v15 }
 0x342   :  { %2483 = vtanh.f32 %v1839_v1 }
 0x343   :  { %2485 = vtanh.f32 %v1840_v52 }
 0x34c   :  { %v2484_v10 = vpop.eup %2483 }
 0x34d   :  { %v2486_v55 = vpop.eup %2485  ;;  %v1846_v14 = vsel %vm1843_vm5, %v2484_v10, %v1839_v1 }
 0x34e   :  { %1848 = vst [vmem:[%s3117_s7] sm:$0xff] %v1846_v14  ;;  %v1847_v60 = vsel %vm1843_vm5, %v2486_v55, %v1840_v52 }
 0x34f   :  { %1849 = vst [vmem:[%s3117_s7 + $0x8] sm:$0xff] %v1847_v60 }

</bundles_post_ra>
